<compile_context>
chip_gen: v7x
topology: tpu7x:2x2x1
jax: 0.10.0
libtpu: 0.0.40
codegen_flags: <defaults>
</compile_context>

<pallas_src>
import functools
import numpy as np
import jax
import jax.numpy as jnp
from jax import lax
from jax.experimental import pallas as pl
from jax.experimental.pallas import tpu as pltpu

_EPS = 1e-5


# ----------------------------- small helpers -----------------------------

def _round_up(x, m):
    return ((x + m - 1) // m) * m


def _cpad(c):
    return _round_up(c, 128)


def _pick_tm(m):
    mp = _round_up(max(m, 8), 8)
    if mp <= 256:
        return mp, mp
    return 256, _round_up(m, 256)


def _pick_tk(k):
    assert k % 128 == 0
    nk = k // 128
    for t in range(1, nk + 1):
        if nk % t == 0 and k // t <= 1024:
            return k // t
    return 128


def _pick_tn(c):
    assert c % 128 == 0
    return 256 if c % 256 == 0 else 128


def _pick_rows(rows, cap=512):
    if rows % 8 != 0 or rows <= cap:
        return rows
    t = cap - (cap % 8)
    while rows % t:
        t -= 8
    return t


# ----------------------------- fused matmul (the conv hot path) -----------------------------

def _mm_kernel(act, pre_relu, has_pre, has_res, *refs):
    if has_pre and has_res:
        a_ref, w_ref, s_ref, b_ref, ps_ref, pb_ref, r_ref, o_ref, acc_ref = refs
    elif has_pre:
        a_ref, w_ref, s_ref, b_ref, ps_ref, pb_ref, o_ref, acc_ref = refs
    elif has_res:
        a_ref, w_ref, s_ref, b_ref, r_ref, o_ref, acc_ref = refs
    else:
        a_ref, w_ref, s_ref, b_ref, o_ref, acc_ref = refs

    k = pl.program_id(2)

    @pl.when(k == 0)
    def _init():
        acc_ref[...] = jnp.zeros_like(acc_ref)

    a = a_ref[...]
    if has_pre:                       # fused pre-conv BatchNorm (per-K scale/bias), f32 math
        a = a.astype(jnp.float32) * ps_ref[...] + pb_ref[...]
    if pre_relu:                      # fused producer ReLU
        a = jnp.maximum(a, 0)
    acc_ref[...] += jnp.dot(a.astype(jnp.bfloat16), w_ref[...],
                            preferred_element_type=jnp.float32)

    @pl.when(k == pl.num_programs(2) - 1)
    def _epilogue():
        y = acc_ref[...] * s_ref[...] + b_ref[...]     # folded eval-mode BN / conv bias
        if has_res:
            y = y + r_ref[...].astype(jnp.float32)     # fused residual add
        if act == "relu":
            y = jnp.maximum(y, 0.0)
        elif act == "sigmoid":
            y = jax.nn.sigmoid(y)
        o_ref[...] = y.astype(o_ref.dtype)


def matmul_fused(a, w, scale, bias, *, act="linear", residual=None,
                 pre_scale=None, pre_bias=None, pre_relu=False,
                 out_dtype=jnp.bfloat16):
    """out = act((act_pre(a) @ w) * scale + bias [+ residual]) with bf16 MXU, f32 accum."""
    M, K = a.shape
    Kw, Cp = w.shape
    assert K == Kw
    tm, Mp = _pick_tm(M)
    tk = _pick_tk(K)
    tn = _pick_tn(Cp)
    if Mp != M:
        a = jnp.pad(a, ((0, Mp - M), (0, 0)))
        if residual is not None:
            residual = jnp.pad(residual, ((0, Mp - M), (0, 0)))

    has_pre = pre_scale is not None
    has_res = residual is not None

    args = [a.astype(jnp.bfloat16), w, scale, bias]
    in_specs = [pl.BlockSpec((tm, tk), lambda i, j, k: (i, k)),
                pl.BlockSpec((tk, tn), lambda i, j, k: (k, j)),
                pl.BlockSpec((1, tn), lambda i, j, k: (0, j)),
                pl.BlockSpec((1, tn), lambda i, j, k: (0, j))]
    if has_pre:
        args += [pre_scale, pre_bias]
        in_specs += [pl.BlockSpec((1, tk), lambda i, j, k: (0, k)),
                     pl.BlockSpec((1, tk), lambda i, j, k: (0, k))]
    if has_res:
        args.append(residual.astype(jnp.bfloat16))
        in_specs.append(pl.BlockSpec((tm, tn), lambda i, j, k: (i, j)))

    out = pl.pallas_call(
        functools.partial(_mm_kernel, act, pre_relu, has_pre, has_res),
        out_shape=jax.ShapeDtypeStruct((Mp, Cp), out_dtype),
        grid=(Mp // tm, Cp // tn, K // tk),
        in_specs=in_specs,
        out_specs=pl.BlockSpec((tm, tn), lambda i, j, k: (i, j)),
        scratch_shapes=[pltpu.VMEM((tm, tn), jnp.float32)],
        compiler_params=pltpu.CompilerParams(
            dimension_semantics=("parallel", "parallel", "arbitrary")),
    )(*args)
    return out[:M] if Mp != M else out


# ----------------------------- elementwise kernels (row-tiled, lane-dense) -----------------------------

def _add_kernel(a_ref, b_ref, o_ref):
    y = a_ref[...].astype(jnp.float32) + b_ref[...].astype(jnp.float32)
    o_ref[...] = y.astype(o_ref.dtype)


def _add_bn_relu_kernel(a_ref, b_ref, s_ref, t_ref, o_ref):
    y = a_ref[...].astype(jnp.float32) + b_ref[...].astype(jnp.float32)
    y = jnp.maximum(y * s_ref[...] + t_ref[...], 0.0)
    o_ref[...] = y.astype(o_ref.dtype)


def _sigmoid_kernel(x_ref, o_ref):
    o_ref[...] = jax.nn.sigmoid(x_ref[...].astype(jnp.float32)).astype(o_ref.dtype)


def _ew2d(kernel_fn, out_dtype, arrays, broadcast_flags):
    rows, cols = arrays[0].shape
    tr = _pick_rows(rows)
    in_specs = [pl.BlockSpec((1, cols), lambda i: (0, 0)) if bc
                else pl.BlockSpec((tr, cols), lambda i: (i, 0))
                for bc in broadcast_flags]
    return pl.pallas_call(
        kernel_fn,
        out_shape=jax.ShapeDtypeStruct((rows, cols), out_dtype),
        grid=(rows // tr,),
        in_specs=in_specs,
        out_specs=pl.BlockSpec((tr, cols), lambda i: (i, 0)),
        compiler_params=pltpu.CompilerParams(dimension_semantics=("parallel",)),
    )(*arrays)


def add(a, b):
    """a + b on channel-padded NHWC tensors (last dim multiple of 128)."""
    c = a.shape[-1]
    out = _ew2d(_add_kernel, a.dtype,
                [a.reshape(-1, c), b.reshape(-1, c)], [False, False])
    return out.reshape(a.shape)


def add_bn_relu(a, b, bn):
    """relu(BN(a + b)) -- the DAPPM 'interp(scale_i(x)) + prev' followed by the process BN+ReLU."""
    c = a.shape[-1]
    out = _ew2d(_add_bn_relu_kernel, a.dtype,
                [a.reshape(-1, c), b.reshape(-1, c),
                 bn["scale"].reshape(1, c), bn["bias"].reshape(1, c)],
                [False, False, True, True])
    return out.reshape(a.shape)


def sigmoid_out(x):
    n = x.size
    npad = _round_up(n, 1024)
    flat = x.reshape(-1)
    if npad != n:
        flat = jnp.pad(flat, (0, npad - n))
    x2 = flat.reshape(npad // 128, 128)
    out = _ew2d(_sigmoid_kernel, jnp.float32, [x2], [False])
    return out.reshape(-1)[:n].reshape(x.shape)


# ----------------------------- conv wrapper (im2col glue + fused matmul) -----------------------------

def conv_fused(x, p, *, stride=1, act="linear", residual=None,
               pre_relu=False, pre_bn=None, out_dtype=jnp.bfloat16):
    """Conv2d(k, pad=(k-1)//2, stride) with folded BN/bias, fused pre-ReLU / pre-BN and
    fused residual + activation epilogue.  x: NHWC bf16 with C padded to p['cin_p']."""
    kh, kw = p["k"]
    cinp, coutp = p["cin_p"], p["cout_p"]
    assert pre_bn is None or (kh == 1 and kw == 1)   # pre-BN fusion only safe for 1x1 convs
    pad = (kh - 1) // 2
    xp = jnp.pad(x, ((0, 0), (pad, pad), (pad, pad), (0, 0))) if pad else x
    N, Hp, Wp, _ = xp.shape
    Ho = (Hp - kh) // stride + 1
    Wo = (Wp - kw) // stride + 1
    M = N * Ho * Wo
    if kh == 1 and kw == 1 and stride == 1:
        a = xp.reshape(M, cinp)                       # free reshape, no im2col
    else:
        cols = [xp[:, i:i + stride * (Ho - 1) + 1:stride,
                   j:j + stride * (Wo - 1) + 1:stride, :]
                for i in range(kh) for j in range(kw)]
        a = jnp.concatenate(cols, axis=-1).reshape(M, kh * kw * cinp)
        # TODO(synk): remove this bf16 im2col for stride-1 3x3 convs via in-kernel tap reduction.
    pre_s = pre_b = None
    if pre_bn is not None:
        pre_s = jnp.tile(pre_bn["scale"], kh * kw).reshape(1, kh * kw * cinp)
        pre_b = jnp.tile(pre_bn["bias"], kh * kw).reshape(1, kh * kw * cinp)
    r = residual.reshape(M, coutp) if residual is not None else None
    y = matmul_fused(a, p["w"], p["scale"], p["bias"], act=act, residual=r,
                     pre_scale=pre_s, pre_bias=pre_b, pre_relu=pre_relu,
                     out_dtype=out_dtype)
    return y.reshape(N, Ho, Wo, coutp)


def avg_pool(x, k, s, p):
    # nn.AvgPool2d(kernel_size=k, stride=s, padding=p), count_include_pad=True
    xf = x.astype(jnp.float32)
    summed = lax.reduce_window(xf, 0.0, lax.add, (1, k, k, 1), (1, s, s, 1),
                               [(0, 0), (p, p), (p, p), (0, 0)])
    return (summed / float(k * k)).astype(x.dtype)


def resize_bilinear(x, H, W):
    # F.interpolate / nn.Upsample, mode='bilinear', align_corners=False
    N, _, _, C = x.shape
    y = jax.image.resize(x.astype(jnp.float32), (N, H, W, C), method="bilinear")
    return y.astype(x.dtype)


# ----------------------------- parameters (synthetic, deterministic, pre-packed) -----------------------------

class KeyGen:
    def __init__(self, seed=0):
        self._key = jax.random.PRNGKey(seed)

    def __call__(self):
        self._key, sub = jax.random.split(self._key)
        return sub


def _fold_bn(kg, c):
    gamma = 1.0 + 0.1 * jax.random.normal(kg(), (c,), jnp.float32)
    beta = 0.1 * jax.random.normal(kg(), (c,), jnp.float32)
    mean = 0.1 * jax.random.normal(kg(), (c,), jnp.float32)
    var = jax.random.uniform(kg(), (c,), jnp.float32, 0.5, 1.5)
    scale = gamma / jnp.sqrt(var + _EPS)
    bias = beta - mean * scale
    return scale, bias


def make_conv(kg, kh, kw, cin, cout, *, plain=False, bias=False):
    """Pre-packed conv: padded (K, Cout_p) bf16 weight + (1, Cout_p) f32 epilogue scale/bias."""
    w = jax.random.normal(kg(), (kh, kw, cin, cout), jnp.float32) / np.sqrt(kh * kw * cin)
    if plain:
        scale = jnp.ones((cout,), jnp.float32)
        b = (0.1 * jax.random.normal(kg(), (cout,), jnp.float32)
             if bias else jnp.zeros((cout,), jnp.float32))
    else:
        scale, b = _fold_bn(kg, cout)
    cinp, coutp = _cpad(cin), _cpad(cout)
    w = jnp.pad(w, ((0, 0), (0, 0), (0, cinp - cin), (0, coutp - cout)))
    return {"w": w.reshape(kh * kw * cinp, coutp).astype(jnp.bfloat16),
            "scale": jnp.pad(scale, (0, coutp - cout)).reshape(1, coutp),
            "bias": jnp.pad(b, (0, coutp - cout)).reshape(1, coutp),
            "k": (kh, kw), "cin": cin, "cin_p": cinp, "cout": cout, "cout_p": coutp}


def make_bn(kg, c):
    s, b = _fold_bn(kg, c)
    cp = _cpad(c)
    return {"scale": jnp.pad(s, (0, cp - c)), "bias": jnp.pad(b, (0, cp - c)), "c_p": cp}


# ----------------------------- blocks -----------------------------

def basic_block_params(kg, cin, planes, stride, shortcut):
    p = {"conv1": make_conv(kg, 3, 3, cin, planes[0]),
         "conv2": make_conv(kg, 3, 3, planes[0], planes[1]),
         "stride": stride}
    if shortcut:
        p["ds"] = make_conv(kg, 1, 1, cin, planes[1])
    return p


def basic_block_fwd(x, p, no_relu, pre_relu_in):
    out = conv_fused(x, p["conv1"], stride=p["stride"], act="relu", pre_relu=pre_relu_in)
    act2 = "linear" if no_relu else "relu"
    if "ds" in p:
        res = conv_fused(x, p["ds"], stride=p["stride"], act="linear", pre_relu=pre_relu_in)
        return conv_fused(out, p["conv2"], act=act2, residual=res)
    # NOTE: matches PyTorch BasicBlock -- `out += residual` only when downsample exists.
    return conv_fused(out, p["conv2"], act=act2)


def make_layer_params(kg, cin, planes, stride, shortcut):
    planes1 = [planes[0], planes[1]]
    planes2 = [planes[2], planes[3]]
    return [basic_block_params(kg, cin, planes1, stride, shortcut),
            basic_block_params(kg, planes1[-1], planes2, 1, False)]


def layer_fwd(x, blocks, pre_relu_in):
    x = basic_block_fwd(x, blocks[0], no_relu=False, pre_relu_in=pre_relu_in)
    x = basic_block_fwd(x, blocks[1], no_relu=True, pre_relu_in=False)
    return x


def bottleneck5_params(kg, cin, planes, stride):
    return {"conv1": make_conv(kg, 1, 1, cin, planes[0]),
            "conv2": make_conv(kg, 3, 3, planes[0], planes[1]),
            "conv3": make_conv(kg, 1, 1, planes[1], planes[2]),
            "ds": make_conv(kg, 1, 1, cin, planes[2]),
            "stride": stride}


def bottleneck5_fwd(x, p, pre_relu_in):
    out = conv_fused(x, p["conv1"], act="relu", pre_relu=pre_relu_in)
    out = conv_fused(out, p["conv2"], stride=p["stride"], act="relu")
    res = conv_fused(x, p["ds"], stride=p["stride"], act="linear", pre_relu=pre_relu_in)
    return conv_fused(out, p["conv3"], act="linear", residual=res)   # no_relu=True


def dappm_params(kg, inplanes, branch, out):
    d = {}
    for name in ("scale0", "scale1", "scale2", "scale4"):
        d[name] = {"bn": make_bn(kg, inplanes),
                   "conv": make_conv(kg, 1, 1, inplanes, branch, plain=True)}
    for name in ("process1", "process2", "process3"):
        d[name] = {"bn": make_bn(kg, branch),
                   "conv": make_conv(kg, 3, 3, branch, branch, plain=True)}
    d["compression"] = {"bn": make_bn(kg, branch * 4),
                        "conv": make_conv(kg, 1, 1, branch * 4, out, plain=True)}
    d["shortcut"] = {"bn": make_bn(kg, inplanes),
                     "conv": make_conv(kg, 1, 1, inplanes, out, plain=True)}
    return d


def dappm_fwd(x, d):
    # branch_planes == 128 exactly, so branch outputs have no channel padding and the
    # concatenation aligns with the compression conv's (branch*4) input layout.
    N, H, W, _ = x.shape
    x0 = conv_fused(x, d["scale0"]["conv"], pre_bn=d["scale0"]["bn"])
    s1 = conv_fused(avg_pool(x, 5, 2, 2), d["scale1"]["conv"], pre_bn=d["scale1"]["bn"])
    t1 = add_bn_relu(resize_bilinear(s1, H, W), x0, d["process1"]["bn"])
    x1 = conv_fused(t1, d["process1"]["conv"])
    s2 = conv_fused(avg_pool(x, 9, 4, 4), d["scale2"]["conv"], pre_bn=d["scale2"]["bn"])
    t2 = add_bn_relu(resize_bilinear(s2, H, W), x1, d["process2"]["bn"])
    x2 = conv_fused(t2, d["process2"]["conv"])
    # AdaptiveAvgPool2d((1,1)) -> mean over H,W (tiny reduction, JAX glue)
    gap = jnp.mean(x.astype(jnp.float32), axis=(1, 2), keepdims=True).astype(x.dtype)
    s4 = conv_fused(gap, d["scale4"]["conv"], pre_bn=d["scale4"]["bn"])
    t3 = add_bn_relu(resize_bilinear(s4, H, W), x2, d["process3"]["bn"])
    x3 = conv_fused(t3, d["process3"]["conv"])
    cat = jnp.concatenate([x0, x1, x2, x3], axis=-1)
    out_dappm = conv_fused(cat, d["compression"]["conv"], pre_bn=d["compression"]["bn"])
    out = conv_fused(x, d["shortcut"]["conv"], pre_bn=d["shortcut"]["bn"],
                     residual=out_dappm)            # out_dappm + shortcut(x)
    return out_dappm, out


# ----------------------------- LaneHeadPrune -----------------------------

def build_params(seed=0, planes=96, spp_planes=128, head_planes=64):
    kg = KeyGen(seed)
    pp_ = [96, 168, 168, 120, 120, 120, 120, 96, 144, 144, 168, 384]
    pp = [96, 288, 312, 144, 288, 408, 624, 288, 720, 576, 648, 1536]
    P = {}
    P["compression3"] = make_conv(kg, 1, 1, pp[4], pp_[4])
    P["compression4"] = make_conv(kg, 1, 1, pp[8], pp_[8])
    P["down3"] = make_conv(kg, 3, 3, pp_[4], pp[4])
    P["down4"] = [make_conv(kg, 1, 1, pp_[8], pp[8] // 4),
                  make_conv(kg, 3, 3, pp[8] // 4, pp[8] // 2),
                  make_conv(kg, 3, 3, pp[8] // 2, pp[8])]
    P["layer3_"] = make_layer_params(kg, pp_[0], pp_[1:5], 1, True)
    P["layer4_"] = make_layer_params(kg, pp_[4], pp_[5:9], 1, False)
    P["layer5_"] = bottleneck5_params(kg, pp_[8], pp_[9:], 1)
    P["layer3"] = make_layer_params(kg, pp[0], pp[1:5], 2, True)
    P["layer4"] = make_layer_params(kg, pp[4], pp[5:9], 2, True)
    P["layer5"] = bottleneck5_params(kg, pp[8], pp[9:], 2)
    P["spp"] = dappm_params(kg, planes * 16, spp_planes, planes * 4)
    P["seg_head"] = {"conv1": make_conv(kg, 3, 3, planes * 4, head_planes),
                     "conv2": make_conv(kg, 1, 1, head_planes, 2, plain=True, bias=True)}
    # TODO(synk): aux_head / scale3 / process4 exist in __init__ but are unused in the
    # deploy forward pass; not instantiated here.
    return P


def lane_head_prune_forward(features, P):
    """forward_single(features, deploy=True): sigmoid lane-seg map, NCHW (N, 2, 8H, 8W)."""
    x = jnp.transpose(features[1], (0, 2, 3, 1)).astype(jnp.bfloat16)   # NCHW -> NHWC
    N, H, W, C = x.shape
    Cp = _cpad(C)
    if Cp != C:
        x = jnp.pad(x, ((0, 0), (0, 0), (0, 0), (0, Cp - C)))

    x_ = layer_fwd(x, P["layer3_"], pre_relu_in=True)          # layer3_(relu(x))
    xl3 = layer_fwd(x, P["layer3"], pre_relu_in=True)          # layer3(relu(x))

    # x = layer3_out + down3(relu(x_))   (residual fused into down3's epilogue)
    x = conv_fused(x_, P["down3"], stride=2, act="linear", residual=xl3, pre_relu=True)
    # x_ = x_ + interp(compression3(relu(layer3_out)))
    c3 = conv_fused(xl3, P["compression3"], act="linear", pre_relu=True)
    x_ = add(x_, resize_bilinear(c3, H, W))

    xl4 = layer_fwd(x, P["layer4"], pre_relu_in=True)          # layer4(relu(x))
    x_ = layer_fwd(x_, P["layer4_"], pre_relu_in=True)         # layer4_(relu(x_))

    # x = layer4_out + down4(relu(x_))
    y = conv_fused(x_, P["down4"][0], act="linear", pre_relu=True)
    y = conv_fused(y, P["down4"][1], stride=2, act="relu")
    x = conv_fused(y, P["down4"][2], stride=2, act="linear", residual=xl4)

    # x_ = x_ + interp(compression4(relu(layer4_out)))
    c4 = conv_fused(xl4, P["compression4"], act="linear", pre_relu=True)
    x_ = add(x_, resize_bilinear(c4, H, W))

    x_ = bottleneck5_fwd(x_, P["layer5_"], pre_relu_in=True)   # layer5_(relu(x_))
    x5 = bottleneck5_fwd(x, P["layer5"], pre_relu_in=True)     # layer5(relu(x))
    _out_dappm, out_sum = dappm_fwd(x5, P["spp"])

    head_in = add(resize_bilinear(out_sum, H, W), x_)

    # segmentation_head: conv3x3 -> BN -> ReLU -> conv1x1(+bias) -> Upsample(x8); then .sigmoid()
    h1 = conv_fused(head_in, P["seg_head"]["conv1"], act="relu")
    h2 = conv_fused(h1, P["seg_head"]["conv2"], act="linear", out_dtype=jnp.float32)
    h2 = h2[..., :P["seg_head"]["conv2"]["cout"]]              # strip lane padding -> 2 channels
    up = resize_bilinear(h2, 8 * H, 8 * W)
    seg = sigmoid_out(up)
    return jnp.transpose(seg, (0, 3, 1, 2))                    # NHWC -> NCHW


if __name__ == "__main__":
    key = jax.random.PRNGKey(0)
    k0, k1 = jax.random.split(key)
    N, H, W = 1, 16, 16
    feat0 = jax.random.normal(k0, (N, 96, 2 * H, 2 * W), jnp.float32)  # features[0] (unused)
    feat1 = jax.random.normal(k1, (N, 96, H, W), jnp.float32)          # features[1] (used)
    params = build_params(seed=0)
    out = lane_head_prune_forward([feat0, feat1], params)
    out = jax.block_until_ready(out)
    assert out.shape == (N, 2, 8 * H, 8 * W), out.shape
    assert bool(jnp.all(jnp.isfinite(out))), "non-finite output"
    assert bool(jnp.all((out >= 0.0) & (out <= 1.0))), "sigmoid range violated"
    print("KERNEL_OK")
</pallas_src>

<mosaic_0001>
module attributes {stable_mosaic.version = 11 : i64} {
  func.func @_mm_kernel(%arg0: i32, %arg1: i32, %arg2: i32, %arg3: memref<256x384xbf16, #tpu.memory_space<vmem>>, %arg4: memref<384x256xbf16, #tpu.memory_space<vmem>>, %arg5: memref<1x256xf32, #tpu.memory_space<vmem>>, %arg6: memref<1x256xf32, #tpu.memory_space<vmem>>, %arg7: memref<256x256xbf16, #tpu.memory_space<vmem>>, %arg8: memref<256x256xf32, #tpu.memory_space<vmem>>) attributes {dimension_semantics = [#tpu.dimension_semantics<parallel>, #tpu.dimension_semantics<parallel>, #tpu.dimension_semantics<arbitrary>], iteration_bounds = array<i64: 1, 1, 3>, scalar_prefetch = 0 : i64, scratch_operands = 1 : i64, tpu.core_type = #tpu.core_type<tc>, window_params = [{transform_indices = @transform_0, window_bounds = array<i64: 256, 384>}, {transform_indices = @transform_1, window_bounds = array<i64: 384, 256>}, {transform_indices = @transform_2, window_bounds = array<i64: 1, 256>}, {transform_indices = @transform_3, window_bounds = array<i64: 1, 256>}, {transform_indices = @transform_4, window_bounds = array<i64: 256, 256>}]} {
    %c0_i32 = arith.constant 0 : i32
    %0 = arith.cmpi eq, %arg2, %c0_i32 : i32
    %1 = arith.extui %0 : i1 to i32
    %c0_i32_0 = arith.constant 0 : i32
    %2 = arith.cmpi ne, %1, %c0_i32_0 : i32
    scf.if %2 {
      %cst_10 = arith.constant 0.000000e+00 : f32
      %14 = vector.broadcast %cst_10 : f32 to vector<256x256xf32>
      %c0_11 = arith.constant 0 : index
      %c0_12 = arith.constant 0 : index
      %15 = vector.load %arg8[%c0_11, %c0_12] : memref<256x256xf32, #tpu.memory_space<vmem>>, vector<256x256xf32>
      tpu.vector_store %arg8[%c0_11, %c0_12], %14 {strides = array<i32>} : memref<256x256xf32, #tpu.memory_space<vmem>>, vector<256x256xf32>,
    } else {
    }
    %c0 = arith.constant 0 : index
    %c0_1 = arith.constant 0 : index
    %3 = vector.load %arg3[%c0, %c0_1] : memref<256x384xbf16, #tpu.memory_space<vmem>>, vector<256x384xbf16>
    %cst = arith.constant 0.000000e+00 : bf16
    %4 = vector.broadcast %cst : bf16 to vector<256x384xbf16>
    %5 = arith.maximumf %3, %4 : vector<256x384xbf16>
    %c0_2 = arith.constant 0 : index
    %c0_3 = arith.constant 0 : index
    %6 = vector.load %arg8[%c0_2, %c0_3] : memref<256x256xf32, #tpu.memory_space<vmem>>, vector<256x256xf32>
    %c0_4 = arith.constant 0 : index
    %c0_5 = arith.constant 0 : index
    %7 = vector.load %arg4[%c0_4, %c0_5] : memref<384x256xbf16, #tpu.memory_space<vmem>>, vector<384x256xbf16>
    %cst_6 = arith.constant dense<0.000000e+00> : vector<256x256xf32>
    %8 = tpu.matmul %5, %7, %cst_6 {dimension_numbers = #tpu.dot_dimension_numbers<[1], [0], [0], [1], [0, 0, 1, 1], [], []>} : vector<256x384xbf16>, vector<384x256xbf16>, vector<256x256xf32> -> vector<256x256xf32>
    %9 = arith.addf %6, %8 : vector<256x256xf32>
    %c0_7 = arith.constant 0 : index
    %c0_8 = arith.constant 0 : index
    %10 = vector.load %arg8[%c0_7, %c0_8] : memref<256x256xf32, #tpu.memory_space<vmem>>, vector<256x256xf32>
    tpu.vector_store %arg8[%c0_7, %c0_8], %9 {strides = array<i32>} : memref<256x256xf32, #tpu.memory_space<vmem>>, vector<256x256xf32>,
    %c2_i32 = arith.constant 2 : i32
    %11 = arith.cmpi eq, %arg2, %c2_i32 : i32
    %12 = arith.extui %11 : i1 to i32
    %c0_i32_9 = arith.constant 0 : i32
    %13 = arith.cmpi ne, %12, %c0_i32_9 : i32
    scf.if %13 {
      %c0_10 = arith.constant 0 : index
      %c0_11 = arith.constant 0 : index
      %14 = vector.load %arg8[%c0_10, %c0_11] : memref<256x256xf32, #tpu.memory_space<vmem>>, vector<256x256xf32>
      %c0_12 = arith.constant 0 : index
      %c0_13 = arith.constant 0 : index
      %15 = vector.load %arg5[%c0_12, %c0_13] : memref<1x256xf32, #tpu.memory_space<vmem>>, vector<1x256xf32>
      %16 = vector.broadcast %15 : vector<1x256xf32> to vector<256x256xf32>
      %17 = arith.mulf %14, %16 : vector<256x256xf32>
      %c0_14 = arith.constant 0 : index
      %c0_15 = arith.constant 0 : index
      %18 = vector.load %arg6[%c0_14, %c0_15] : memref<1x256xf32, #tpu.memory_space<vmem>>, vector<1x256xf32>
      %19 = vector.broadcast %18 : vector<1x256xf32> to vector<256x256xf32>
      %20 = arith.addf %17, %19 : vector<256x256xf32>
      %cst_16 = arith.constant 0.000000e+00 : f32
      %21 = vector.broadcast %cst_16 : f32 to vector<256x256xf32>
      %22 = arith.maximumf %20, %21 : vector<256x256xf32>
      %23 = arith.truncf %22 : vector<256x256xf32> to vector<256x256xbf16>
      %c0_17 = arith.constant 0 : index
      %c0_18 = arith.constant 0 : index
      %24 = vector.load %arg7[%c0_17, %c0_18] : memref<256x256xbf16, #tpu.memory_space<vmem>>, vector<256x256xbf16>
      tpu.vector_store %arg7[%c0_17, %c0_18], %23 {strides = array<i32>} : memref<256x256xbf16, #tpu.memory_space<vmem>>, vector<256x256xbf16>,
    } else {
    }
    return
  }
  func.func @transform_0(%arg0: i32, %arg1: i32, %arg2: i32) -> (i32, i32) {
    %c0_i32 = arith.constant 0 : i32
    return %arg0, %arg2 : i32, i32
  }
  func.func @transform_1(%arg0: i32, %arg1: i32, %arg2: i32) -> (i32, i32) {
    %c0_i32 = arith.constant 0 : i32
    return %arg2, %arg1 : i32, i32
  }
  func.func @transform_2(%arg0: i32, %arg1: i32, %arg2: i32) -> (i32, i32) {
    %c0_i32 = arith.constant 0 : i32
    %c0_i32_0 = arith.constant 0 : i32
    return %c0_i32, %arg1 : i32, i32
  }
  func.func @transform_3(%arg0: i32, %arg1: i32, %arg2: i32) -> (i32, i32) {
    %c0_i32 = arith.constant 0 : i32
    %c0_i32_0 = arith.constant 0 : i32
    return %c0_i32, %arg1 : i32, i32
  }
  func.func @transform_4(%arg0: i32, %arg1: i32, %arg2: i32) -> (i32, i32) {
    %c0_i32 = arith.constant 0 : i32
    return %arg0, %arg1 : i32, i32
  }
}

</mosaic_0001>

<bundles_post_ra>
// kernel: tpu_custom_call.1
= control target key start
LH: loop header
LB: loop body
LE: loop exit
PB: predicated region body
PF: predicated region fallthrough
CT: control target
= control target key end

     0   :  { %9 = vsyncpa [#allocation4], 0  ;;  %s3540_s0 = inlined_call_operand.hbm [shape: bf16[256,1152], index: 0, kind: input, shape index: {}]   ;;  %s3541_s1 = inlined_call_operand.hbm [shape: bf16[1152,256], index: 1, kind: input, shape index: {}]   ;;  %s3542_s2 = inlined_call_operand.vmem [shape: f32[1,256], index: 2, kind: input, shape index: {}]   ;;  %s3543_s3 = inlined_call_operand.vmem [shape: f32[1,256], index: 3, kind: input, shape index: {}]   ;;  %s3544_s4 = inlined_call_operand.hbm [shape: bf16[256,256], index: 4, kind: output, shape index: {}]  }
   0x1   :  { %11 = vsyncpa [#allocation4 + $0x1], 0 }
   0x2   :  { %12 = vsyncpa [#allocation7], 0 }
   0x3   :  { %14 = vsyncpa [#allocation7 + $0x1], 0 }
   0x4   :  { %15 = vsyncpa [#allocation5], 0  ;;  %s2863_s15 = smov 0   ;;  %s2865_s16 = smov 0  }
   0x5   :  { %s2867_s17 = smov 0   ;;  %s2869_s18 = smov 0  }
   0x6   :  { %s2871_s19 = smov 0   ;;  %s2873_s20 = smov 0  }
   0x7 LB: > { %s2286_s21 = sadd.s32 4294967295, %s2824_s20   ;;  %s33_s22 = sadd.s32 1, %s2820_s19  ;;  %s2824_s20 = sphi %s2873_s20, %s21_s20   ;;  %s2820_s19 = sphi %s2871_s19, %s3556_s19   ;;  %s2816_s18 = sphi %s2869_s18, %s3555_s18   ;;  %s2812_s17 = sphi %s2867_s17, %s3554_s17   ;;  %s2808_s16 = sphi %s2865_s16, %s3553_s16   ;;  %s2804_s15 = sphi %s2863_s15, %s3552_s15  }
   0x8   : > { %p34_p0 = scmp.ge.s32.totalorder %s33_s22, 3  ;;  %s49_s23 = sadd.s32 1, %s2812_s17 }
   0x9   : > { %p56_p1 = scmp.ne.s32.totalorder %s2812_s17, %s2808_s16  ;;  %p57_p2 = scmp.eq.s32.totalorder %s2824_s20, 0 }
   0xa   : > { %s3558_s22 = smov (%p34_p0, %s33_s22), 0  ;;  %p62_p4 = scmp.ne.s32.totalorder %s2808_s16, %s2804_s15 }
   0xb   : > { %p58_p3 = por %p57_p2, %p56_p1  ;;  %s45_s24 = ssub.s32 %s2820_s19, %s3558_s22 }
   0xc   : > { %p63_p5 = scmp.eq.s32.totalorder %s2286_s21, 0  ;;  %p47_p6 = scmp.eq.s32.totalorder %s45_s24, 0 }
   0xd   : > { %p2547_p8 = scmp.lt.s32.totalorder %s2824_s20, 3  ;;  %s2913_s27 = sand.u32 1, %s2812_s17  }
   0xe   : > { %p2904_p7 = por %p63_p5, %p62_p4  ;;  %s2429_s28 = smul.u32 192, %s2820_s19 }
   0xf   : > { %s2910_s26 = scalar_select %p47_p6, %s2812_s17, %s49_s23  }
  0x10   : > { %s3546_s25 = scalar_select %p2904_p7, 1, 0 }
  0x11   : > { %s2529_s29 = smul.u32 384, %s2913_s27  ;;  %s2920_s6 = scalar_lea.hbm %s3540_s0, %s2429_s28 }
  0x12   : > { %p2922_p9 = pnand %p2547_p8, %p58_p3  ;;  %s211_s10 = scalar_lea.sflag [#allocation4], %s2913_s27 }
  0x13   : > { %s214_s8 = scalar_lea.vmem [#allocation3], %s2529_s29  ;;  %s2680_s11 = scalar_lea.hbm %s2920_s6, 6144 }
  0x14   : > { %s224_s9 = sshll.u32 %s214_s8, 4  ;;  %p2681_p11 = scmp.ne.s32.totalorder %s2920_s6, %s2680_s11  ;;  %s2928_s9 = int_to_ptr.vmem [resolvable:$true] %s224_s9 }
  0x15   : > { %p2682_p12 = pneg %p2922_p9  ;;  %s2685_s14 = scalar_lea.hbm %s3540_s0, 18432 }
  0x16   : > { %p2686_p1 = scmp.lt.u32.totalorder %s2920_s6, %s3540_s0  ;;  %p2687_p2 = scmp.lt.u32.totalorder %s2685_s14, %s2680_s11 }
  0x17   : > { %p2683_p13 = pnand %p2682_p12, %p2681_p11  ;;  %p2689_p4 = scmp.lt.u32.totalorder %s2680_s11, %s2920_s6 }
  0x18   : > { %p2688_p3 = por %p2687_p2, %p2686_p1 }
  0x19   : > { %p2684_p0 = pneg %p2683_p13 }
  0x1a   : > { %p2690_p5 = por %p2689_p4, %p2688_p3 }
  0x1c   : > { %p2691_p6 = pnand %p2690_p5, %p2684_p0 }
  0x1e   : > { %2694 = shalt.err (!%p2691_p6)
}
  0x1f   : > { %s2695_s24 = scalar_lea.vmem %s2928_s9, 6144  ;;  %s2826_s28 = smov [#allocation3]  }
  0x20   : > { %p2696_p8 = scmp.ne.s32.totalorder %s2928_s9, %s2695_s24  ;;  %s2700_s30 = sshll.u32 %s2826_s28, 4  ;;  %s2701_s30 = int_to_ptr.vmem [resolvable:$false] %s2700_s30 }
  0x21   : > { %s2702_s5 = scalar_lea.vmem %s2701_s30, 12288  ;;  %p2703_p10 = scmp.lt.s32.totalorder %s2928_s9, %s2701_s30 }
  0x22   : > { %p2698_p11 = pnand %p2696_p8, %p2682_p12  ;;  %p2704_p1 = scmp.lt.s32.totalorder %s2702_s5, %s2695_s24 }
  0x24   : > { %p2699_p13 = pneg %p2698_p11  ;;  %p2705_p2 = por %p2704_p1, %p2703_p10 }
  0x26   : > { %p2706_p3 = pnand %p2705_p2, %p2699_p13 }
  0x28   : > { %2709 = shalt.err (!%p2706_p3)
}
  0x29   : > { %s2827_s8 = smov 576   ;;  %s2828_s11 = smov 192  }
  0x2a   : > { %s2829_s12 = smov 12   ;;  %p256_p0 = scmp.lt.s32.totalorder %s2824_s20, 4 }
  0x2b   : > { %2543 = dma.hbm_to_vmem [thread:$0]  (!%p2922_p9), %s2920_s6, 6144, %s2928_s9, %s211_s10, %s2827_s8, %s2828_s11, %s2829_s12  }
  0x2c   : > { %s2464_s13 = smul.u32 6144, %s2820_s19  ;;  %p3548_p10 = scmp.ge.s32.totalorder %s2824_s20, 1 }
  0x2d   : > { %s238_s15 = scalar_lea.vmem [#allocation6], %s2529_s29  ;;  %s235_s6 = scalar_lea.sflag [#allocation7], %s2913_s27 }
  0x2e   : > { %p2963_p4 = pnand %p3548_p10, %p256_p0  ;;  %s248_s23 = sshll.u32 %s238_s15, 4  ;;  %s2974_s23 = int_to_ptr.vmem [resolvable:$true] %s248_s23 }
  0x2f   : > { %s2972_s30 = scalar_lea.hbm %s3541_s1, %s2464_s13  ;;  %s2715_s5 = scalar_lea.hbm %s3541_s1, 18432 }
  0x30   : > { %s2710_s9 = scalar_lea.hbm %s2972_s30, 6144  ;;  %p2716_p11 = scmp.lt.u32.totalorder %s2972_s30, %s3541_s1 }
  0x31   : > { %p2711_p5 = scmp.ne.s32.totalorder %s2972_s30, %s2710_s9  ;;  %p2717_p13 = scmp.lt.u32.totalorder %s2715_s5, %s2710_s9 }
  0x32   : > { %p2719_p2 = scmp.lt.u32.totalorder %s2710_s9, %s2972_s30 }
  0x33   : > { %p2713_p6 = pnand %p2711_p5, %p2682_p12  ;;  %p2718_p1 = por %p2717_p13, %p2716_p11 }
  0x35   : > { %p2714_p8 = pneg %p2713_p6  ;;  %p2720_p3 = por %p2719_p2, %p2718_p1 }
  0x37   : > { %p2721_p0 = pnand %p2720_p3, %p2714_p8 }
  0x39   : > { %2724 = shalt.err (!%p2721_p0)
}
  0x3a   : > { %s2725_s12 = scalar_lea.vmem %s2974_s23, 6144  ;;  %s2830_s13 = smov [#allocation6]  }
  0x3b   : > { %p2726_p10 = scmp.ne.s32.totalorder %s2974_s23, %s2725_s12  ;;  %s2730_s15 = sshll.u32 %s2830_s13, 4  ;;  %s2731_s15 = int_to_ptr.vmem [resolvable:$false] %s2730_s15 }
  0x3c   : > { %s2732_s24 = scalar_lea.vmem %s2731_s15, 12288  ;;  %p2733_p7 = scmp.lt.s32.totalorder %s2974_s23, %s2731_s15 }
  0x3d   : > { %p2728_p5 = pnand %p2726_p10, %p2682_p12  ;;  %p2734_p11 = scmp.lt.s32.totalorder %s2732_s24, %s2725_s12 }
  0x3f   : > { %p2729_p6 = pneg %p2728_p5  ;;  %p2735_p13 = por %p2734_p11, %p2733_p7 }
  0x41   : > { %p2736_p1 = pnand %p2735_p13, %p2729_p6 }
  0x43   : > { %2739 = shalt.err (!%p2736_p1)
}
  0x44   : > { %s2831_s28 = smov 128   ;;  %s2832_s9 = smov 8  }
  0x45   : > { %2546 = dma.hbm_to_vmem [thread:$0]  (!%p2922_p9), %s2972_s30, 6144, %s2974_s23, %s235_s6, %s2831_s28, %s2831_s28, %s2832_s9  }
  0x46   : > { %260 = sbr.rel (%p2963_p4) target bundleno = 599 (0x257), region = 36  ;;  %s262_s29 = sand.u32 (!%p2963_p4), 1, %s2808_s16  }
  0x47   : > { %s2531_s10 = smul.u32 (!%p2963_p4), 384, %s262_s29  ;;  %s263_s5 = scalar_lea.sflag (!%p2963_p4), [#allocation4], %s262_s29 }
  0x48   : > { %p3550_p7 = scmp.ne.s32.totalorder (!%p2963_p4), %s3546_s25, 0 }
  0x49   : > { %s3005_s8 = scalar_lea.vmem (!%p2963_p4), [#allocation3], %s2531_s10 }
  0x4d   : > { %2791 = dma.done.wait (%p3550_p7), %s263_s5, 6144  }
  0x4e   : > { %2793 = vsyncadd (%p3550_p7), %s263_s5, 4294961152  ;;  %s272_s11 = scalar_lea.sflag [#allocation7], %s262_s29  ;;  %s3011_s7 = scalar_lea.vmem [#allocation6], %s2531_s10 }
  0x4f   : > { %2795 = dma.done.wait (%p3550_p7), %s272_s11, 6144  }
  0x50   : > { %2797 = vsyncadd (%p3550_p7), %s272_s11, 4294961152  ;;  %p2295_p9 = scmp.ne.s32.totalorder %s2816_s18, 0 }
  0x51   : > { %v2833_v0 = vmov (!%p2295_p9), 0.0  }
  0x52   : > { %328 = sbr.rel (%p2295_p9) target bundleno = 114 (0x72), region = 48  ;;  %329 = vst [vmem:[#allocation2] sm:$0xff] (!%p2295_p9), %v2833_v0  ;;  %330 = vst [vmem:[#allocation2 + $0x8] sm:$0xff] (!%p2295_p9), %v2833_v0 }
  0x53   : > { %331 = vst [vmem:[#allocation2 + $0x10] sm:$0xff] (!%p2295_p9), %v2833_v0  ;;  %332 = vst [vmem:[#allocation2 + $0x18] sm:$0xff] (!%p2295_p9), %v2833_v0 }
  0x54   : > { %333 = vst [vmem:[#allocation2 + $0x20] sm:$0xff] (!%p2295_p9), %v2833_v0  ;;  %334 = vst [vmem:[#allocation2 + $0x28] sm:$0xff] (!%p2295_p9), %v2833_v0 }
  0x55   : > { %335 = vst [vmem:[#allocation2 + $0x30] sm:$0xff] (!%p2295_p9), %v2833_v0  ;;  %336 = vst [vmem:[#allocation2 + $0x38] sm:$0xff] (!%p2295_p9), %v2833_v0 }
  0x56   : > { %337 = vst [vmem:[#allocation2 + $0x40] sm:$0xff] (!%p2295_p9), %v2833_v0  ;;  %338 = vst [vmem:[#allocation2 + $0x48] sm:$0xff] (!%p2295_p9), %v2833_v0 }
  0x57   : > { %339 = vst [vmem:[#allocation2 + $0x50] sm:$0xff] (!%p2295_p9), %v2833_v0  ;;  %340 = vst [vmem:[#allocation2 + $0x58] sm:$0xff] (!%p2295_p9), %v2833_v0 }
  0x58   : > { %341 = vst [vmem:[#allocation2 + $0x60] sm:$0xff] (!%p2295_p9), %v2833_v0  ;;  %342 = vst [vmem:[#allocation2 + $0x68] sm:$0xff] (!%p2295_p9), %v2833_v0 }
  0x59   : > { %343 = vst [vmem:[#allocation2 + $0x70] sm:$0xff] %v2833_v0  ;;  %344 = vst [vmem:[#allocation2 + $0x78] sm:$0xff] %v2833_v0 }
  0x5a   : > { %345 = vst [vmem:[#allocation2 + $0x80] sm:$0xff] %v2833_v0  ;;  %346 = vst [vmem:[#allocation2 + $0x88] sm:$0xff] %v2833_v0 }
  0x5b   : > { %347 = vst [vmem:[#allocation2 + $0x90] sm:$0xff] %v2833_v0  ;;  %348 = vst [vmem:[#allocation2 + $0x98] sm:$0xff] %v2833_v0 }
  0x5c   : > { %349 = vst [vmem:[#allocation2 + $0xa0] sm:$0xff] %v2833_v0  ;;  %350 = vst [vmem:[#allocation2 + $0xa8] sm:$0xff] %v2833_v0 }
  0x5d   : > { %351 = vst [vmem:[#allocation2 + $0xb0] sm:$0xff] %v2833_v0  ;;  %352 = vst [vmem:[#allocation2 + $0xb8] sm:$0xff] %v2833_v0 }
  0x5e   : > { %353 = vst [vmem:[#allocation2 + $0xc0] sm:$0xff] %v2833_v0  ;;  %354 = vst [vmem:[#allocation2 + $0xc8] sm:$0xff] %v2833_v0 }
  0x5f   : > { %355 = vst [vmem:[#allocation2 + $0xd0] sm:$0xff] %v2833_v0  ;;  %356 = vst [vmem:[#allocation2 + $0xd8] sm:$0xff] %v2833_v0 }
  0x60   : > { %357 = vst [vmem:[#allocation2 + $0xe0] sm:$0xff] %v2833_v0  ;;  %358 = vst [vmem:[#allocation2 + $0xe8] sm:$0xff] %v2833_v0 }
  0x61   : > { %359 = vst [vmem:[#allocation2 + $0xf0] sm:$0xff] %v2833_v0  ;;  %360 = vst [vmem:[#allocation2 + $0xf8] sm:$0xff] %v2833_v0 }
  0x62   : > { %361 = vst [vmem:[#allocation2 + $0x100] sm:$0xff] %v2833_v0  ;;  %362 = vst [vmem:[#allocation2 + $0x108] sm:$0xff] %v2833_v0 }
  0x63   : > { %363 = vst [vmem:[#allocation2 + $0x110] sm:$0xff] %v2833_v0  ;;  %364 = vst [vmem:[#allocation2 + $0x118] sm:$0xff] %v2833_v0 }
  0x64   : > { %365 = vst [vmem:[#allocation2 + $0x120] sm:$0xff] %v2833_v0  ;;  %366 = vst [vmem:[#allocation2 + $0x128] sm:$0xff] %v2833_v0 }
  0x65   : > { %367 = vst [vmem:[#allocation2 + $0x130] sm:$0xff] %v2833_v0  ;;  %368 = vst [vmem:[#allocation2 + $0x138] sm:$0xff] %v2833_v0 }
  0x66   : > { %369 = vst [vmem:[#allocation2 + $0x140] sm:$0xff] %v2833_v0  ;;  %370 = vst [vmem:[#allocation2 + $0x148] sm:$0xff] %v2833_v0 }
  0x67   : > { %371 = vst [vmem:[#allocation2 + $0x150] sm:$0xff] %v2833_v0  ;;  %372 = vst [vmem:[#allocation2 + $0x158] sm:$0xff] %v2833_v0 }
  0x68   : > { %373 = vst [vmem:[#allocation2 + $0x160] sm:$0xff] %v2833_v0  ;;  %374 = vst [vmem:[#allocation2 + $0x168] sm:$0xff] %v2833_v0 }
  0x69   : > { %375 = vst [vmem:[#allocation2 + $0x170] sm:$0xff] %v2833_v0  ;;  %376 = vst [vmem:[#allocation2 + $0x178] sm:$0xff] %v2833_v0 }
  0x6a   : > { %377 = vst [vmem:[#allocation2 + $0x180] sm:$0xff] %v2833_v0  ;;  %378 = vst [vmem:[#allocation2 + $0x188] sm:$0xff] %v2833_v0 }
  0x6b   : > { %379 = vst [vmem:[#allocation2 + $0x190] sm:$0xff] %v2833_v0  ;;  %380 = vst [vmem:[#allocation2 + $0x198] sm:$0xff] %v2833_v0 }
  0x6c   : > { %381 = vst [vmem:[#allocation2 + $0x1a0] sm:$0xff] %v2833_v0  ;;  %382 = vst [vmem:[#allocation2 + $0x1a8] sm:$0xff] %v2833_v0 }
  0x6d   : > { %383 = vst [vmem:[#allocation2 + $0x1b0] sm:$0xff] %v2833_v0  ;;  %384 = vst [vmem:[#allocation2 + $0x1b8] sm:$0xff] %v2833_v0 }
  0x6e   : > { %385 = vst [vmem:[#allocation2 + $0x1c0] sm:$0xff] %v2833_v0  ;;  %386 = vst [vmem:[#allocation2 + $0x1c8] sm:$0xff] %v2833_v0 }
  0x6f   : > { %387 = vst [vmem:[#allocation2 + $0x1d0] sm:$0xff] %v2833_v0  ;;  %388 = vst [vmem:[#allocation2 + $0x1d8] sm:$0xff] %v2833_v0 }
  0x70   : > { %389 = vst [vmem:[#allocation2 + $0x1e0] sm:$0xff] %v2833_v0  ;;  %390 = vst [vmem:[#allocation2 + $0x1e8] sm:$0xff] %v2833_v0 }
  0x71   : > { %391 = vst [vmem:[#allocation2 + $0x1f0] sm:$0xff] %v2833_v0  ;;  %392 = vst [vmem:[#allocation2 + $0x1f8] sm:$0xff] %v2833_v0 }
  0x72 PF: > { %v2608_v1 = vld [vmem:[%s3011_s7 + $0x4] ss:$8 sps:$4 sm:$0xff]   ;;  %v2610_v2 = vld [vmem:[%s3011_s7] ss:$8 sps:$4 sm:$0xff]   ;;  %v2834_v3 = vmov 0   ;;  %p2392_p12 = scmp.ne.s32.totalorder %s2816_s18, 2 }
  0x73   : > { %1354 = vmatprep.mubr.bf16.mxu0 %v2834_v3  ;;  %1129 = vmatprep.subr.bf16.mxu1 %v2608_v1  ;;  %v2611_v4 = vld [vmem:[%s3011_s7 + $0x14] ss:$8 sps:$4 sm:$0xff]   ;;  %v2613_v5 = vld [vmem:[%s3011_s7 + $0x10] ss:$8 sps:$4 sm:$0xff]   ;;  %v2614_v6 = vld [vmem:[%s3011_s7 + $0x24] ss:$8 sps:$4 sm:$0xff]  }
  0x74   : > { %1130 = vmatpush1.bf16.msra.mxu1 %v2610_v2  ;;  %v2616_v7 = vld [vmem:[%s3011_s7 + $0x20] ss:$8 sps:$4 sm:$0xff]   ;;  %v2617_v8 = vld [vmem:[%s3011_s7 + $0x34] ss:$8 sps:$4 sm:$0xff]   ;;  %v2619_v9 = vld [vmem:[%s3011_s7 + $0x30] ss:$8 sps:$4 sm:$0xff]  }
  0x75   : > { %1131 = vmatprep.subr.bf16.mxu1 %v2611_v4  ;;  %v2632_v10 = vld [vmem:[%s3011_s7 + $0x104] ss:$8 sps:$4 sm:$0xff]   ;;  %v2634_v11 = vld [vmem:[%s3011_s7 + $0x100] ss:$8 sps:$4 sm:$0xff]   ;;  %v2638_v13 = vld [vmem:[%s3011_s7 + $0x114] ss:$8 sps:$4 sm:$0xff]  }
  0x76   : > { %v2620_v12 = vld [vmem:[%s3011_s7 + $0x44] ss:$8 sps:$4 sm:$0xff]   ;;  %1322 = vmatprep.subr.bf16.mxu0 %v2632_v10  ;;  %v2640_v14 = vld [vmem:[%s3011_s7 + $0x110] ss:$8 sps:$4 sm:$0xff]   ;;  %v2622_v15 = vld [vmem:[%s3011_s7 + $0x40] ss:$8 sps:$4 sm:$0xff]  }
  0x77   : > { %1323 = vmatpush1.bf16.msra.mxu0 %v2634_v11  ;;  %v2623_v16 = vld [vmem:[%s3011_s7 + $0x54] ss:$8 sps:$4 sm:$0xff]   ;;  %v2644_v17 = vld [vmem:[%s3011_s7 + $0x124] ss:$8 sps:$4 sm:$0xff]   ;;  %v2646_v18 = vld [vmem:[%s3011_s7 + $0x120] ss:$8 sps:$4 sm:$0xff]  }
  0x78   : > { %1132 = vmatpush1.bf16.msra.mxu1 %v2613_v5  ;;  %1324 = vmatprep.subr.bf16.mxu0 %v2638_v13  ;;  %v2625_v19 = vld [vmem:[%s3011_s7 + $0x50] ss:$8 sps:$4 sm:$0xff]   ;;  %v2650_v20 = vld [vmem:[%s3011_s7 + $0x134] ss:$8 sps:$4 sm:$0xff]   ;;  %v2626_v21 = vld [vmem:[%s3011_s7 + $0x64] ss:$8 sps:$4 sm:$0xff]  }
  0x79   : > { %1133 = vmatprep.subr.bf16.mxu1 %v2614_v6  ;;  %v2652_v22 = vld [vmem:[%s3011_s7 + $0x130] ss:$8 sps:$4 sm:$0xff]   ;;  %v2628_v23 = vld [vmem:[%s3011_s7 + $0x60] ss:$8 sps:$4 sm:$0xff]   ;;  %v2656_v24 = vld [vmem:[%s3011_s7 + $0x144] ss:$8 sps:$4 sm:$0xff]  }
  0x7a   : > { %v2629_v25 = vld [vmem:[%s3011_s7 + $0x74] ss:$8 sps:$4 sm:$0xff]   ;;  %v2658_v26 = vld [vmem:[%s3011_s7 + $0x140] ss:$8 sps:$4 sm:$0xff]   ;;  %v2631_v27 = vld [vmem:[%s3011_s7 + $0x70] ss:$8 sps:$4 sm:$0xff]  }
  0x7b   : > { %1325 = vmatpush1.bf16.msra.mxu0 %v2640_v14  ;;  %v2662_v28 = vld [vmem:[%s3011_s7 + $0x154] ss:$8 sps:$4 sm:$0xff]   ;;  %v2635_v29 = vld [vmem:[%s3011_s7 + $0x84] ss:$8 sps:$4 sm:$0xff]   ;;  %v2664_v30 = vld [vmem:[%s3011_s7 + $0x150] ss:$8 sps:$4 sm:$0xff]  }
  0x7c   : > { %1134 = vmatpush1.bf16.msra.mxu1 %v2616_v7  ;;  %1326 = vmatprep.subr.bf16.mxu0 %v2644_v17  ;;  %v2637_v31 = vld [vmem:[%s3011_s7 + $0x80] ss:$8 sps:$4 sm:$0xff]   ;;  %v2668_v32 = vld [vmem:[%s3011_s7 + $0x164] ss:$8 sps:$4 sm:$0xff]   ;;  %v2641_v33 = vld [vmem:[%s3011_s7 + $0x94] ss:$8 sps:$4 sm:$0xff]  }
  0x7d   : > { %1135 = vmatprep.subr.bf16.mxu1 %v2617_v8  ;;  %v393_v34 = vld [vmem:[%s3005_s8] sm:$0xff]  ;;  %v395_v35 = vld [vmem:[%s3005_s8 + $0xc] sm:$0xff]  ;;  %v394_v38 = vld [vmem:[%s3005_s8 + $0x8] sm:$0xf] }
  0x7e   : > { %v3118_v36 = vmax.bf16 %v2834_v3, %v393_v34  ;;  %v2670_v37 = vld [vmem:[%s3011_s7 + $0x160] ss:$8 sps:$4 sm:$0xff]   ;;  %v396_v39 = vld [vmem:[%s3005_s8 + $0x14] sm:$0xf]  ;;  %v3124_v40 = vmax.bf16 %v2834_v3, %v395_v35  ;;  %v2643_v41 = vld [vmem:[%s3011_s7 + $0x90] ss:$8 sps:$4 sm:$0xff]   ;;  %v458_v45 = vmax.bf16 %v2834_v3, %v394_v38 }
  0x7f   : > { %1327 = vmatpush1.bf16.msra.mxu0 %v2646_v18  ;;  %v2674_v42 = vld [vmem:[%s3011_s7 + $0x174] ss:$8 sps:$4 sm:$0xff]   ;;  %v2647_v43 = vld [vmem:[%s3011_s7 + $0xa4] ss:$8 sps:$4 sm:$0xff]   ;;  %v460_v46 = vmax.bf16 %v2834_v3, %v396_v39  ;;  %v2676_v47 = vld [vmem:[%s3011_s7 + $0x170] ss:$8 sps:$4 sm:$0xff]  }
  0x80   : > { %1136 = vmatpush1.bf16.msra.mxu1 %v2619_v9  ;;  %1328 = vmatprep.subr.bf16.mxu0 %v2650_v20  ;;  %v2297_v44 = vcombine.high %v3118_v36, %v3124_v40  ;;  %v2649_v48 = vld [vmem:[%s3011_s7 + $0xa0] ss:$8 sps:$4 sm:$0xff]   ;;  %v2653_v49 = vld [vmem:[%s3011_s7 + $0xb4] ss:$8 sps:$4 sm:$0xff]   ;;  %v400_v52 = vld [vmem:[%s3005_s8 + $0x2c] sm:$0xf] }
  0x81   : > { %1137 = vmatprep.subr.bf16.mxu1 %v2620_v12  ;;  %v2298_v50 = vcombine.low %v458_v45, %v460_v46  ;;  %v398_v51 = vld [vmem:[%s3005_s8 + $0x20] sm:$0xf]  ;;  %v2655_v53 = vld [vmem:[%s3011_s7 + $0xb0] ss:$8 sps:$4 sm:$0xff]   ;;  %v2659_v54 = vld [vmem:[%s3011_s7 + $0xc4] ss:$8 sps:$4 sm:$0xff]   ;;  %v464_v56 = vmax.bf16 %v2834_v3, %v400_v52 }
  0x82   : > { %1161 = vmatprep.mubr.bf16.mxu1 %v2297_v44  ;;  %v462_v55 = vmax.bf16 %v2834_v3, %v398_v51  ;;  %v2661_v57 = vld [vmem:[%s3011_s7 + $0xc0] ss:$8 sps:$4 sm:$0xff]   ;;  %v2665_v58 = vld [vmem:[%s3011_s7 + $0xd4] ss:$8 sps:$4 sm:$0xff]   ;;  %v402_v60 = vld [vmem:[%s3005_s8 + $0x38] sm:$0xf] }
  0x83   : > { %1329 = vmatpush1.bf16.msra.mxu0 %v2652_v22  ;;  %v404_v61 = vld [vmem:[%s3005_s8 + $0x44] sm:$0xf]  ;;  %v2667_v62 = vld [vmem:[%s3011_s7 + $0xd0] ss:$8 sps:$4 sm:$0xff]   ;;  %v466_v0 = vmax.bf16 %v2834_v3, %v402_v60  ;;  %v2673_v2 = vld [vmem:[%s3011_s7 + $0xe0] ss:$8 sps:$4 sm:$0xff]  }
  0x84   : > { %1138 = vmatpush1.bf16.msra.mxu1 %v2622_v15  ;;  %1330 = vmatprep.subr.bf16.mxu0 %v2656_v24  ;;  %v2301_v59 = vcombine.low %v462_v55, %v464_v56  ;;  %v2671_v63 = vld [vmem:[%s3011_s7 + $0xe4] ss:$8 sps:$4 sm:$0xff]   ;;  %v468_v1 = vmax.bf16 %v2834_v3, %v404_v61  ;;  %v2677_v4 = vld [vmem:[%s3011_s7 + $0xf4] ss:$8 sps:$4 sm:$0xff]   ;;  %v406_v8 = vld [vmem:[%s3005_s8 + $0x50] sm:$0xf]  ;;  %v2296_v15 = vcombine.low %v3118_v36, %v3124_v40 }
  0x85   : > { %1139 = vmatprep.subr.bf16.mxu1 %v2623_v16  ;;  %v397_v5 = vld [vmem:[%s3005_s8 + $0x18] sm:$0xff]  ;;  %v399_v6 = vld [vmem:[%s3005_s8 + $0x24] sm:$0xff]  ;;  %v470_v13 = vmax.bf16 %v2834_v3, %v406_v8  ;;  %v401_v17 = vld [vmem:[%s3005_s8 + $0x30] sm:$0xff] }
  0x86   : > { %v2304_v7 = vcombine.low %v466_v0, %v468_v1  ;;  %v408_v9 = vld [vmem:[%s3005_s8 + $0x5c] sm:$0xf]  ;;  %v2679_v10 = vld [vmem:[%s3011_s7 + $0xf0] ss:$8 sps:$4 sm:$0xff]   ;;  %v461_v11 = vmax.bf16 %v2834_v3, %v397_v5  ;;  %v463_v12 = vmax.bf16 %v2834_v3, %v399_v6  ;;  %v410_v20 = vld [vmem:[%s3005_s8 + $0x68] sm:$0xf]  ;;  %v465_v22 = vmax.bf16 %v2834_v3, %v401_v17 }
  0x87   : > { %1331 = vmatpush1.bf16.msra.mxu0 %v2658_v26  ;;  %v472_v14 = vmax.bf16 %v2834_v3, %v408_v9  ;;  %v403_v18 = vld [vmem:[%s3005_s8 + $0x3c] sm:$0xff]  ;;  %v474_v24 = vmax.bf16 %v2834_v3, %v410_v20  ;;  %v411_v40 = vld [vmem:[%s3005_s8 + $0x6c] sm:$0xff]  ;;  %v415_v51 = vld [vmem:[%s3005_s8 + $0x84] sm:$0xff] }
  0x88   : > { %1140 = vmatpush1.bf16.msra.mxu1 %v2625_v19  ;;  %1332 = vmatprep.subr.bf16.mxu0 %v2662_v28  ;;  %v2300_v16 = vcombine.high %v461_v11, %v463_v12  ;;  %v2299_v26 = vcombine.low %v461_v11, %v463_v12  ;;  %v405_v28 = vld [vmem:[%s3005_s8 + $0x48] sm:$0xff]  ;;  %v409_v39 = vld [vmem:[%s3005_s8 + $0x60] sm:$0xff]  ;;  %v475_v45 = vmax.bf16 %v2834_v3, %v411_v40  ;;  %v417_v61 = vld [vmem:[%s3005_s8 + $0x90] sm:$0xff] }
  0x89   : > { %1141 = vmatprep.subr.bf16.mxu1 %v2626_v21  ;;  %v2307_v19 = vcombine.low %v470_v13, %v472_v14  ;;  %v412_v21 = vld [vmem:[%s3005_s8 + $0x74] sm:$0xf]  ;;  %v473_v44 = vmax.bf16 %v2834_v3, %v409_v39  ;;  %v479_v56 = vmax.bf16 %v2834_v3, %v415_v51  ;;  %v426_v0 = vld [vmem:[%s3005_s8 + $0xc8] sm:$0xf]  ;;  %v430_v12 = vld [vmem:[%s3005_s8 + $0xe0] sm:$0xf] }
  0x8a   : > { %v428_v1 = vld [vmem:[%s3005_s8 + $0xd4] sm:$0xf]  ;;  %v490_v5 = vmax.bf16 %v2834_v3, %v426_v0  ;;  %v421_v9 = vld [vmem:[%s3005_s8 + $0xa8] sm:$0xff]  ;;  %v425_v20 = vld [vmem:[%s3005_s8 + $0xc0] sm:$0xff] }
  0x8b   : > { %1333 = vmatpush1.bf16.msra.mxu0 %v2664_v30  ;;  %v492_v6 = vmax.bf16 %v2834_v3, %v428_v1  ;;  %v432_v13 = vld [vmem:[%s3005_s8 + $0xec] sm:$0xf]  ;;  %v485_v14 = vmax.bf16 %v2834_v3, %v421_v9  ;;  %v441_v0 = vld [vmem:[%s3005_s8 + $0x120] sm:$0xff] }
  0x8c   : > { %1142 = vmatpush1.bf16.msra.mxu1 %v2628_v23  ;;  %1334 = vmatprep.subr.bf16.mxu0 %v2668_v32  ;;  %v467_v23 = vmax.bf16 %v2834_v3, %v403_v18  ;;  %v416_v32 = vld [vmem:[%s3005_s8 + $0x8c] sm:$0xf]  ;;  %v496_v17 = vmax.bf16 %v2834_v3, %v432_v13  ;;  %v447_v13 = vld [vmem:[%s3005_s8 + $0x144] sm:$0xff] }
  0x8d   : > { %1143 = vmatprep.subr.bf16.mxu1 %v2629_v25  ;;  %v476_v25 = vmax.bf16 %v2834_v3, %v412_v21  ;;  %v480_v36 = vmax.bf16 %v2834_v3, %v416_v32  ;;  %v2322_v11 = vcombine.low %v490_v5, %v492_v6  ;;  %v427_v21 = vld [vmem:[%s3005_s8 + $0xcc] sm:$0xff]  ;;  %v431_v32 = vld [vmem:[%s3005_s8 + $0xe4] sm:$0xff]  ;;  %v505_v6 = vmax.bf16 %v2834_v3, %v441_v0 }
  0x8e   : > { %v443_v1 = vld [vmem:[%s3005_s8 + $0x12c] sm:$0xff]  ;;  %v452_v5 = vld [vmem:[%s3005_s8 + $0x164] sm:$0xf] }
  0x8f   : > { %1335 = vmatpush1.bf16.msra.mxu0 %v2670_v37  ;;  %v2310_v30 = vcombine.low %v474_v24, %v476_v25  ;;  %v2302_v37 = vcombine.low %v465_v22, %v467_v23  ;;  %v436_v24 = vld [vmem:[%s3005_s8 + $0x104] sm:$0xf]  ;;  %v489_v25 = vmax.bf16 %v2834_v3, %v425_v20  ;;  %v516_v9 = vmax.bf16 %v2834_v3, %v452_v5 }
  0x90   : > { %1144 = vmatpush1.bf16.msra.mxu1 %v2631_v27  ;;  %1336 = vmatprep.subr.bf16.mxu0 %v2674_v42  ;;  %v2303_v27 = vcombine.high %v465_v22, %v467_v23  ;;  %v418_v42 = vld [vmem:[%s3005_s8 + $0x98] sm:$0xf]  ;;  %v525_v5 = vld [vmem:[#allocation2 + $0x20] sm:$0xff] }
  0x91   : > { %1145 = vmatprep.subr.bf16.mxu1 %v2635_v29  ;;  %v407_v29 = vld [vmem:[%s3005_s8 + $0x54] sm:$0xff]  ;;  %v482_v46 = vmax.bf16 %v2834_v3, %v418_v42 }
  0x92   : > { %v471_v34 = vmax.bf16 %v2834_v3, %v407_v29  ;;  %v434_v23 = vld [vmem:[%s3005_s8 + $0xf8] sm:$0xf]  ;;  %v433_v42 = vld [vmem:[%s3005_s8 + $0xf0] sm:$0xff] }
  0x93   : > { %1337 = vmatpush1.bf16.msra.mxu0 %v2676_v47 }
  0x94   : > { %1146 = vmatpush1.bf16.msra.mxu1 %v2637_v31  ;;  %v414_v31 = vld [vmem:[%s3005_s8 + $0x80] sm:$0xf] }
  0x95   : > { %1147 = vmatprep.subr.bf16.mxu1 %v2641_v33  ;;  %v469_v33 = vmax.bf16 %v2834_v3, %v405_v28  ;;  %v478_v35 = vmax.bf16 %v2834_v3, %v414_v31  ;;  %v500_v28 = vmax.bf16 %v2834_v3, %v436_v24  ;;  %v429_v31 = vld [vmem:[%s3005_s8 + $0xd8] sm:$0xff] }
  0x96   : > { %1355 = vmatmul.mubr.bf16.vlgmr.msra.gmra.mrb[0].mxu0 %v2298_v50  ;;  %v413_v50 = vld [vmem:[%s3005_s8 + $0x78] sm:$0xff] }
  0x97   : > { %1364 = vmatprep.mubr.bf16.mxu0 %v2834_v3  ;;  %v2306_v38 = vcombine.high %v469_v33, %v471_v34  ;;  %v477_v55 = vmax.bf16 %v2834_v3, %v413_v50  ;;  %v451_v24 = vld [vmem:[%s3005_s8 + $0x15c] sm:$0xff] }
  0x98   : > { %1148 = vmatpush1.bf16.msra.mxu1 %v2643_v41  ;;  %v2313_v41 = vcombine.low %v478_v35, %v480_v36  ;;  %v440_v35 = vld [vmem:[%s3005_s8 + $0x11c] sm:$0xf]  ;;  %v493_v36 = vmax.bf16 %v2834_v3, %v429_v31  ;;  %v455_v31 = vld [vmem:[%s3005_s8 + $0x174] sm:$0xff] }
  0x99   : > { %1149 = vmatprep.subr.bf16.mxu1 %v2647_v43  ;;  %v420_v43 = vld [vmem:[%s3005_s8 + $0xa4] sm:$0xf]  ;;  %v2312_v60 = vcombine.high %v477_v55, %v479_v56  ;;  %v504_v39 = vmax.bf16 %v2834_v3, %v440_v35 }
  0x9a   : > { %v484_v47 = vmax.bf16 %v2834_v3, %v420_v43  ;;  %v435_v43 = vld [vmem:[%s3005_s8 + $0xfc] sm:$0xff] }
  0x9c   : > { %1150 = vmatpush1.bf16.msra.mxu1 %v2649_v48  ;;  %v2305_v48 = vcombine.low %v469_v33, %v471_v34  ;;  %v2316_v52 = vcombine.low %v482_v46, %v484_v47  ;;  %v438_v34 = vld [vmem:[%s3005_s8 + $0x110] sm:$0xf]  ;;  %v444_v46 = vld [vmem:[%s3005_s8 + $0x134] sm:$0xf]  ;;  %v497_v47 = vmax.bf16 %v2834_v3, %v433_v42 }
  0x9d   : > { %1151 = vmatprep.subr.bf16.mxu1 %v2653_v49  ;;  %v2309_v49 = vcombine.high %v473_v44, %v475_v45  ;;  %v508_v50 = vmax.bf16 %v2834_v3, %v444_v46 }
  0x9e   : > { %1365 = vmatmul.mubr.bf16.gmra.mrb[4].mxu0 %v2301_v59  ;;  %v2308_v59 = vcombine.low %v473_v44, %v475_v45  ;;  %v442_v45 = vld [vmem:[%s3005_s8 + $0x128] sm:$0xf] }
  0x9f   : > { %1374 = vmatprep.mubr.bf16.mxu0 %v2834_v3 }
  0xa0   : > { %1152 = vmatpush1.bf16.msra.mxu1 %v2655_v53  ;;  %v422_v53 = vld [vmem:[%s3005_s8 + $0xb0] sm:$0xf] }
  0xa1   : > { %1153 = vmatprep.subr.bf16.mxu1 %v2659_v54  ;;  %v424_v54 = vld [vmem:[%s3005_s8 + $0xbc] sm:$0xf] }
  0xa4   : > { %1154 = vmatpush1.bf16.msra.mxu1 %v2661_v57  ;;  %v486_v57 = vmax.bf16 %v2834_v3, %v422_v53  ;;  %v437_v53 = vld [vmem:[%s3005_s8 + $0x108] sm:$0xff] }
  0xa5   : > { %1155 = vmatprep.subr.bf16.mxu1 %v2665_v58  ;;  %v488_v58 = vmax.bf16 %v2834_v3, %v424_v54  ;;  %v439_v54 = vld [vmem:[%s3005_s8 + $0x114] sm:$0xff] }
  0xa6   : > { %1375 = vmatmul.mubr.bf16.gmra.mrb[8].mxu0 %v2304_v7  ;;  %v2311_v7 = vcombine.low %v477_v55, %v479_v56  ;;  %v446_v56 = vld [vmem:[%s3005_s8 + $0x140] sm:$0xf] }
  0xa7   : > { %1384 = vmatprep.mubr.bf16.mxu0 %v2834_v3 }
  0xa8   : > { %1156 = vmatpush1.bf16.msra.mxu1 %v2667_v62  ;;  %v419_v62 = vld [vmem:[%s3005_s8 + $0x9c] sm:$0xff] }
  0xa9   : > { %1157 = vmatprep.subr.bf16.mxu1 %v2671_v63  ;;  %v2319_v63 = vcombine.low %v486_v57, %v488_v58  ;;  %v448_v57 = vld [vmem:[%s3005_s8 + $0x14c] sm:$0xf]  ;;  %v501_v58 = vmax.bf16 %v2834_v3, %v437_v53 }
  0xac   : > { %1158 = vmatpush1.bf16.msra.mxu1 %v2673_v2  ;;  %v481_v2 = vmax.bf16 %v2834_v3, %v417_v61  ;;  %v512_v61 = vmax.bf16 %v2834_v3, %v448_v57 }
  0xad   : > { %1159 = vmatprep.subr.bf16.mxu1 %v2677_v4  ;;  %v483_v4 = vmax.bf16 %v2834_v3, %v419_v62 }
  0xae   : > { %1385 = vmatmul.mubr.bf16.gmra.mrb[12].mxu0 %v2307_v19 }
  0xaf   : > { %1394 = vmatprep.mubr.bf16.mxu0 %v2834_v3  ;;  %v2315_v8 = vcombine.high %v481_v2, %v483_v4  ;;  %v2314_v18 = vcombine.low %v481_v2, %v483_v4  ;;  %v450_v4 = vld [vmem:[%s3005_s8 + $0x158] sm:$0xf] }
  0xb0   : > { %1160 = vmatpush1.bf16.msra.mxu1 %v2679_v10  ;;  %v423_v10 = vld [vmem:[%s3005_s8 + $0xb4] sm:$0xff] }
  0xb3   : > { %1162 = vmatmul.mubr.bf16.vlgmr.msra.gmra.mrb[0].mxu1 %v2296_v15  ;;  %v487_v15 = vmax.bf16 %v2834_v3, %v423_v10 }
  0xb4   : > { %1171 = vmatprep.mubr.bf16.mxu1 %v2300_v16  ;;  %v494_v16 = vmax.bf16 %v2834_v3, %v430_v12  ;;  %v445_v12 = vld [vmem:[%s3005_s8 + $0x138] sm:$0xff] }
  0xb5   : > { %v2318_v19 = vcombine.high %v485_v14, %v487_v15  ;;  %v2317_v29 = vcombine.low %v485_v14, %v487_v15  ;;  %v454_v15 = vld [vmem:[%s3005_s8 + $0x170] sm:$0xf] }
  0xb6   : > { %1395 = vmatmul.mubr.bf16.gmra.mrb[16].mxu0 %v2310_v30  ;;  %v2325_v22 = vcombine.low %v494_v16, %v496_v17  ;;  %v456_v16 = vld [vmem:[%s3005_s8 + $0x17c] sm:$0xf]  ;;  %v509_v17 = vmax.bf16 %v2834_v3, %v445_v12 }
  0xb7   : > { %1404 = vmatprep.mubr.bf16.mxu0 %v2834_v3  ;;  %v520_v20 = vmax.bf16 %v2834_v3, %v456_v16 }
  0xbb   : > { %1172 = vmatmul.mubr.bf16.gmra.mrb[4].mxu1 %v2299_v26  ;;  %v491_v26 = vmax.bf16 %v2834_v3, %v427_v21 }
  0xbc   : > { %1181 = vmatprep.mubr.bf16.mxu1 %v2303_v27  ;;  %v498_v27 = vmax.bf16 %v2834_v3, %v434_v23  ;;  %v449_v23 = vld [vmem:[%s3005_s8 + $0x150] sm:$0xff] }
  0xbd   : > { %v2321_v30 = vcombine.high %v489_v25, %v491_v26  ;;  %v2320_v40 = vcombine.low %v489_v25, %v491_v26  ;;  %v513_v26 = vmax.bf16 %v2834_v3, %v449_v23 }
  0xbe   : > { %1405 = vmatmul.mubr.bf16.gmra.mrb[20].mxu0 %v2313_v41  ;;  %v2328_v33 = vcombine.low %v498_v27, %v500_v28  ;;  %v515_v27 = vmax.bf16 %v2834_v3, %v451_v24 }
  0xbf   : > { %1414 = vmatprep.mubr.bf16.mxu0 %v2834_v3 }
  0xc3   : > { %1182 = vmatmul.mubr.bf16.gmra.mrb[8].mxu1 %v2302_v37  ;;  %v495_v37 = vmax.bf16 %v2834_v3, %v431_v32 }
  0xc4   : > { %1191 = vmatprep.mubr.bf16.mxu1 %v2306_v38  ;;  %v502_v38 = vmax.bf16 %v2834_v3, %v438_v34  ;;  %v2338_v34 = vcombine.low %v513_v26, %v515_v27 }
  0xc5   : > { %v2324_v41 = vcombine.high %v493_v36, %v495_v37  ;;  %v2323_v51 = vcombine.low %v493_v36, %v495_v37 }
  0xc6   : > { %1415 = vmatmul.mubr.bf16.gmra.mrb[24].mxu0 %v2316_v52  ;;  %v2331_v44 = vcombine.low %v502_v38, %v504_v39 }
  0xc7   : > { %1424 = vmatprep.mubr.bf16.mxu0 %v2834_v3 }
  0xcb   : > { %1192 = vmatmul.mubr.bf16.gmra.mrb[12].mxu1 %v2305_v48  ;;  %v499_v48 = vmax.bf16 %v2834_v3, %v435_v43 }
  0xcc   : > { %1201 = vmatprep.mubr.bf16.mxu1 %v2309_v49  ;;  %v506_v49 = vmax.bf16 %v2834_v3, %v442_v45 }
  0xcd   : > { %v2327_v52 = vcombine.high %v497_v47, %v499_v48  ;;  %v2326_v62 = vcombine.low %v497_v47, %v499_v48 }
  0xce   : > { %1425 = vmatmul.mubr.bf16.gmra.mrb[28].mxu0 %v2319_v63  ;;  %v2334_v55 = vcombine.low %v506_v49, %v508_v50 }
  0xcf   : > { %1434 = vmatprep.mubr.bf16.mxu0 %v2834_v3 }
  0xd3   : > { %1202 = vmatmul.mubr.bf16.gmra.mrb[16].mxu1 %v2308_v59  ;;  %v503_v59 = vmax.bf16 %v2834_v3, %v439_v54  ;;  %v523_v54 = vld [vmem:[#allocation2 + $0x10] sm:$0xff] }
  0xd4   : > { %1211 = vmatprep.mubr.bf16.mxu1 %v2312_v60  ;;  %v510_v60 = vmax.bf16 %v2834_v3, %v446_v56 }
  0xd5   : > { %v2330_v63 = vcombine.high %v501_v58, %v503_v59  ;;  %v2329_v10 = vcombine.low %v501_v58, %v503_v59  ;;  %v524_v58 = vld [vmem:[#allocation2 + $0x18] sm:$0xff] }
  0xd6   : > { %1435 = vmatmul.mubr.bf16.gmra.mrb[32].mxu0 %v2322_v11  ;;  %v2337_v2 = vcombine.low %v510_v60, %v512_v61 }
  0xd7   : > { %1444 = vmatprep.mubr.bf16.mxu0 %v2834_v3 }
  0xdb   : > { %1212 = vmatmul.mubr.bf16.gmra.mrb[20].mxu1 %v2311_v7  ;;  %v507_v7 = vmax.bf16 %v2834_v3, %v443_v1 }
  0xdc   : > { %1221 = vmatprep.mubr.bf16.mxu1 %v2315_v8  ;;  %v514_v8 = vmax.bf16 %v2834_v3, %v450_v4 }
  0xdd   : > { %v2333_v11 = vcombine.high %v505_v6, %v507_v7  ;;  %v2332_v21 = vcombine.low %v505_v6, %v507_v7 }
  0xde   : > { %1445 = vmatmul.mubr.bf16.gmra.mrb[36].mxu0 %v2325_v22  ;;  %v2340_v14 = vcombine.low %v514_v8, %v516_v9  ;;  %v526_v8 = vld [vmem:[#allocation2 + $0x28] sm:$0xff] }
  0xdf   : > { %1454 = vmatprep.mubr.bf16.mxu0 %v2834_v3 }
  0xe3   : > { %1222 = vmatmul.mubr.bf16.gmra.mrb[24].mxu1 %v2314_v18  ;;  %v511_v18 = vmax.bf16 %v2834_v3, %v447_v13 }
  0xe4   : > { %1231 = vmatprep.mubr.bf16.mxu1 %v2318_v19  ;;  %v518_v19 = vmax.bf16 %v2834_v3, %v454_v15  ;;  %v528_v15 = vld [vmem:[#allocation2 + $0x38] sm:$0xff] }
  0xe5   : > { %v2336_v22 = vcombine.high %v509_v17, %v511_v18  ;;  %v2335_v28 = vcombine.low %v509_v17, %v511_v18 }
  0xe6   : > { %1455 = vmatmul.mubr.bf16.gmra.mrb[40].mxu0 %v2328_v33  ;;  %v2343_v25 = vcombine.low %v518_v19, %v520_v20  ;;  %v519_v33 = vmax.bf16 %v2834_v3, %v455_v31  ;;  %v531_v31 = vld [vmem:[#allocation2 + $0x50] sm:$0xff] }
  0xe7   : > { %1464 = vmatprep.mubr.bf16.mxu0 %v2834_v3 }
  0xeb   : > { %1232 = vmatmul.mubr.bf16.gmra.mrb[28].mxu1 %v2317_v29  ;;  %v2339_v29 = vcombine.high %v513_v26, %v515_v27 }
  0xec   : > { %1241 = vmatprep.mubr.bf16.mxu1 %v2321_v30  ;;  %v453_v30 = vld [vmem:[%s3005_s8 + $0x168] sm:$0xff] }
  0xed   : > { %v517_v32 = vmax.bf16 %v2834_v3, %v453_v30 }
  0xee   : > { %1465 = vmatmul.mubr.bf16.gmra.mrb[44].mxu0 %v2331_v44 }
  0xef   : > { %1474 = vmatprep.mubr.bf16.mxu0 %v2834_v3  ;;  %v2342_v35 = vcombine.high %v517_v32, %v519_v33  ;;  %v2341_v36 = vcombine.low %v517_v32, %v519_v33 }
  0xf3   : > { %1242 = vmatmul.mubr.bf16.gmra.mrb[32].mxu1 %v2320_v40 }
  0xf4   : > { %1251 = vmatprep.mubr.bf16.mxu1 %v2324_v41 }
  0xf6   : > { %1475 = vmatmul.mubr.bf16.gmra.mrb[48].mxu0 %v2334_v55 }
  0xf7   : > { %1484 = vmatprep.mubr.bf16.mxu0 %v2834_v3 }
  0xfb   : > { %1252 = vmatmul.mubr.bf16.gmra.mrb[36].mxu1 %v2323_v51  ;;  %v522_v51 = vld [vmem:[#allocation2 + $0x8] sm:$0xff] }
  0xfc   : > { %1261 = vmatprep.mubr.bf16.mxu1 %v2327_v52 }
  0xfe   : > { %1485 = vmatmul.mubr.bf16.gmra.mrb[52].mxu0 %v2337_v2 }
  0xff   : > { %1494 = vmatprep.mubr.bf16.mxu0 %v2834_v3 }
 0x103   : > { %1262 = vmatmul.mubr.bf16.gmra.mrb[40].mxu1 %v2326_v62 }
 0x104   : > { %1271 = vmatprep.mubr.bf16.mxu1 %v2330_v63 }
 0x106   : > { %1495 = vmatmul.mubr.bf16.gmra.mrb[56].mxu0 %v2340_v14 }
 0x107   : > { %1504 = vmatprep.mubr.bf16.mxu0 %v2834_v3  ;;  %v521_v3 = vld [vmem:[#allocation2] sm:$0xff] }
 0x10b   : > { %1272 = vmatmul.mubr.bf16.gmra.mrb[44].mxu1 %v2329_v10 }
 0x10c   : > { %1281 = vmatprep.mubr.bf16.mxu1 %v2333_v11  ;;  %v527_v11 = vld [vmem:[#allocation2 + $0x30] sm:$0xff] }
 0x10e   : > { %1505 = vmatmul.mubr.bf16.gmra.mrb[60].mxu0 %v2343_v25  ;;  %v529_v25 = vld [vmem:[#allocation2 + $0x40] sm:$0xff] }
 0x113   : > { %1282 = vmatmul.mubr.bf16.gmra.mrb[48].mxu1 %v2332_v21 }
 0x114   : > { %1291 = vmatprep.mubr.bf16.mxu1 %v2336_v22 }
 0x11b   : > { %1292 = vmatmul.mubr.bf16.gmra.mrb[52].mxu1 %v2335_v28  ;;  %v530_v28 = vld [vmem:[#allocation2 + $0x48] sm:$0xff] }
 0x11c   : > { %1301 = vmatprep.mubr.bf16.mxu1 %v2339_v29 }
 0x123   : > { %1302 = vmatmul.mubr.bf16.gmra.mrb[56].mxu1 %v2338_v34 }
 0x124   : > { %1311 = vmatprep.mubr.bf16.mxu1 %v2342_v35  ;;  %v532_v35 = vld [vmem:[#allocation2 + $0x58] sm:$0xff] }
 0x12b   : > { %1312 = vmatmul.mubr.bf16.gmra.mrb[60].mxu1 %v2341_v36 }
 0x169   : > { %v1356_v37 = vpop.f32.mrb[0].mxu0 }
 0x16a   : > { %v1358_v38 = vpop.f32.mrb[1].mxu0 }
 0x16b   : > { %v1360_v39 = vpop.f32.mrb[2].mxu0 }
 0x16c   : > { %v1362_v40 = vpop.f32.mrb[3].mxu0 }
 0x171   : > { %v1366_v41 = vpop.f32.mrb[4].mxu0 }
 0x172   : > { %v1368_v42 = vpop.f32.mrb[5].mxu0 }
 0x173   : > { %v1370_v43 = vpop.f32.mrb[6].mxu0 }
 0x174   : > { %v1372_v44 = vpop.f32.mrb[7].mxu0 }
 0x179   : > { %v1376_v45 = vpop.f32.mrb[8].mxu0 }
 0x17a   : > { %v1378_v46 = vpop.f32.mrb[9].mxu0 }
 0x17b   : > { %v1380_v47 = vpop.f32.mrb[10].mxu0 }
 0x17c   : > { %v3282_v48 = vpop.f32.mrb[11].mxu0 }
 0x181   : > { %v1386_v60 = vpop.f32.mrb[12].mxu0 }
 0x182   : > { %v1388_v63 = vpop.f32.mrb[13].mxu0 }
 0x183   : > { %v3284_v1 = vpop.f32.mrb[14].mxu0 }
 0x184   : > { %v3286_v4 = vpop.f32.mrb[15].mxu0 }
 0x186   : > { %v1163_v49 = vpop.f32.mrb[0].mxu1 }
 0x187   : > { %v1357_v50 = vadd.f32 %v1356_v37, %v1163_v49  ;;  %v1165_v52 = vpop.f32.mrb[1].mxu1 }
 0x188   : > { %v1359_v53 = vadd.f32 %v1358_v38, %v1165_v52  ;;  %v1167_v55 = vpop.f32.mrb[2].mxu1 }
 0x189   : > { %v1515_v56 = vadd.f32 %v1357_v50, %v521_v3  ;;  %v1361_v57 = vadd.f32 %v1360_v39, %v1167_v55  ;;  %v1169_v59 = vpop.f32.mrb[3].mxu1  ;;  %v1396_v17 = vpop.f32.mrb[16].mxu0  ;;  %v534_v3 = vld [vmem:[#allocation2 + $0x68] sm:$0xff] }
 0x18a   : > { %v1516_v61 = vadd.f32 %v1359_v53, %v522_v51  ;;  %v1363_v62 = vadd.f32 %v1362_v40, %v1169_v59  ;;  %v1398_v20 = vpop.f32.mrb[17].mxu0  ;;  %v535_v51 = vld [vmem:[#allocation2 + $0x70] sm:$0xff] }
 0x18b   : > { %1579 = vst [vmem:[#allocation2] sm:$0xff] %v1515_v56  ;;  %v1517_v0 = vadd.f32 %v1361_v57, %v523_v54  ;;  %v3288_v22 = vpop.f32.mrb[18].mxu0  ;;  %v536_v54 = vld [vmem:[#allocation2 + $0x78] sm:$0xff] }
 0x18c   : > { %1580 = vst [vmem:[#allocation2 + $0x8] sm:$0xff] %v1516_v61  ;;  %v1518_v2 = vadd.f32 %v1363_v62, %v524_v58  ;;  %v3290_v24 = vpop.f32.mrb[19].mxu0 }
 0x18d   : > { %1581 = vst [vmem:[#allocation2 + $0x10] sm:$0xff] %v1517_v0 }
 0x18e   : > { %1582 = vst [vmem:[#allocation2 + $0x18] sm:$0xff] %v1518_v2  ;;  %v1173_v6 = vpop.f32.mrb[4].mxu1 }
 0x18f   : > { %v1367_v7 = vadd.f32 %v1366_v41, %v1173_v6  ;;  %v1175_v9 = vpop.f32.mrb[5].mxu1 }
 0x190   : > { %v1369_v10 = vadd.f32 %v1368_v42, %v1175_v9  ;;  %v1177_v12 = vpop.f32.mrb[6].mxu1 }
 0x191   : > { %v1519_v13 = vadd.f32 %v1367_v7, %v525_v5  ;;  %v1371_v14 = vadd.f32 %v1370_v43, %v1177_v12  ;;  %v1179_v16 = vpop.f32.mrb[7].mxu1  ;;  %v1406_v37 = vpop.f32.mrb[20].mxu0  ;;  %v538_v5 = vld [vmem:[#allocation2 + $0x88] sm:$0xff] }
 0x192   : > { %v1520_v18 = vadd.f32 %v1369_v10, %v526_v8  ;;  %v1373_v19 = vadd.f32 %v1372_v44, %v1179_v16  ;;  %v1408_v40 = vpop.f32.mrb[21].mxu0  ;;  %v539_v8 = vld [vmem:[#allocation2 + $0x90] sm:$0xff] }
 0x193   : > { %1583 = vst [vmem:[#allocation2 + $0x20] sm:$0xff] %v1519_v13  ;;  %v1521_v21 = vadd.f32 %v1371_v14, %v527_v11  ;;  %v3293_v42 = vpop.f32.mrb[22].mxu0  ;;  %v540_v11 = vld [vmem:[#allocation2 + $0x98] sm:$0xff] }
 0x194   : > { %1584 = vst [vmem:[#allocation2 + $0x28] sm:$0xff] %v1520_v18  ;;  %v1522_v23 = vadd.f32 %v1373_v19, %v528_v15  ;;  %v3295_v44 = vpop.f32.mrb[23].mxu0 }
 0x195   : > { %1585 = vst [vmem:[#allocation2 + $0x30] sm:$0xff] %v1521_v21 }
 0x196   : > { %1586 = vst [vmem:[#allocation2 + $0x38] sm:$0xff] %v1522_v23  ;;  %v1183_v26 = vpop.f32.mrb[8].mxu1 }
 0x197   : > { %v1377_v27 = vadd.f32 %v1376_v45, %v1183_v26  ;;  %v1185_v29 = vpop.f32.mrb[9].mxu1  ;;  %v533_v45 = vld [vmem:[#allocation2 + $0x60] sm:$0xff] }
 0x198   : > { %v1379_v30 = vadd.f32 %v1378_v46, %v1185_v29  ;;  %v1187_v32 = vpop.f32.mrb[10].mxu1 }
 0x199   : > { %v1523_v33 = vadd.f32 %v1377_v27, %v529_v25  ;;  %v1381_v34 = vadd.f32 %v1380_v47, %v1187_v32  ;;  %v1189_v36 = vpop.f32.mrb[11].mxu1  ;;  %v1416_v56 = vpop.f32.mrb[24].mxu0  ;;  %v542_v25 = vld [vmem:[#allocation2 + $0xa8] sm:$0xff] }
 0x19a   : > { %v1524_v38 = vadd.f32 %v1379_v30, %v530_v28  ;;  %v1383_v39 = vadd.f32 %v3282_v48, %v1189_v36  ;;  %v1418_v59 = vpop.f32.mrb[25].mxu0  ;;  %v543_v28 = vld [vmem:[#allocation2 + $0xb0] sm:$0xff] }
 0x19b   : > { %1587 = vst [vmem:[#allocation2 + $0x40] sm:$0xff] %v1523_v33  ;;  %v1525_v41 = vadd.f32 %v1381_v34, %v531_v31  ;;  %v3299_v62 = vpop.f32.mrb[26].mxu0  ;;  %v544_v31 = vld [vmem:[#allocation2 + $0xb8] sm:$0xff] }
 0x19c   : > { %1588 = vst [vmem:[#allocation2 + $0x48] sm:$0xff] %v1524_v38  ;;  %v1526_v43 = vadd.f32 %v1383_v39, %v532_v35  ;;  %v3301_v0 = vpop.f32.mrb[27].mxu0 }
 0x19d   : > { %1589 = vst [vmem:[#allocation2 + $0x50] sm:$0xff] %v1525_v41 }
 0x19e   : > { %1590 = vst [vmem:[#allocation2 + $0x58] sm:$0xff] %v1526_v43  ;;  %v1193_v46 = vpop.f32.mrb[12].mxu1 }
 0x19f   : > { %v1387_v47 = vadd.f32 %v1386_v60, %v1193_v46  ;;  %v1195_v49 = vpop.f32.mrb[13].mxu1 }
 0x1a0   : > { %v1389_v50 = vadd.f32 %v1388_v63, %v1195_v49  ;;  %v1197_v52 = vpop.f32.mrb[14].mxu1  ;;  %v537_v63 = vld [vmem:[#allocation2 + $0x80] sm:$0xff] }
 0x1a1   : > { %v1527_v48 = vadd.f32 %v1387_v47, %v533_v45  ;;  %v1391_v53 = vadd.f32 %v3284_v1, %v1197_v52  ;;  %v1199_v55 = vpop.f32.mrb[15].mxu1  ;;  %v1426_v13 = vpop.f32.mrb[28].mxu0  ;;  %v546_v45 = vld [vmem:[#allocation2 + $0xc8] sm:$0xff] }
 0x1a2   : > { %v1528_v57 = vadd.f32 %v1389_v50, %v534_v3  ;;  %v1393_v58 = vadd.f32 %v3286_v4, %v1199_v55  ;;  %v1428_v16 = vpop.f32.mrb[29].mxu0  ;;  %v547_v3 = vld [vmem:[#allocation2 + $0xd0] sm:$0xff] }
 0x1a3   : > { %1591 = vst [vmem:[#allocation2 + $0x60] sm:$0xff] %v1527_v48  ;;  %v1529_v61 = vadd.f32 %v1391_v53, %v535_v51  ;;  %v3305_v19 = vpop.f32.mrb[30].mxu0  ;;  %v548_v51 = vld [vmem:[#allocation2 + $0xd8] sm:$0xff] }
 0x1a4   : > { %1592 = vst [vmem:[#allocation2 + $0x68] sm:$0xff] %v1528_v57  ;;  %v1530_v60 = vadd.f32 %v1393_v58, %v536_v54  ;;  %v3307_v21 = vpop.f32.mrb[31].mxu0 }
 0x1a5   : > { %1593 = vst [vmem:[#allocation2 + $0x70] sm:$0xff] %v1529_v61 }
 0x1a6   : > { %1594 = vst [vmem:[#allocation2 + $0x78] sm:$0xff] %v1530_v60  ;;  %v1203_v2 = vpop.f32.mrb[16].mxu1 }
 0x1a7   : > { %v1397_v1 = vadd.f32 %v1396_v17, %v1203_v2  ;;  %v1205_v6 = vpop.f32.mrb[17].mxu1 }
 0x1a8   : > { %v1399_v7 = vadd.f32 %v1398_v20, %v1205_v6  ;;  %v1207_v9 = vpop.f32.mrb[18].mxu1  ;;  %v541_v20 = vld [vmem:[#allocation2 + $0xa0] sm:$0xff] }
 0x1a9   : > { %v1531_v4 = vadd.f32 %v1397_v1, %v537_v63  ;;  %v1401_v10 = vadd.f32 %v3288_v22, %v1207_v9  ;;  %v1209_v12 = vpop.f32.mrb[19].mxu1  ;;  %v1436_v33 = vpop.f32.mrb[32].mxu0  ;;  %v550_v63 = vld [vmem:[#allocation2 + $0xe8] sm:$0xff] }
 0x1aa   : > { %v1532_v14 = vadd.f32 %v1399_v7, %v538_v5  ;;  %v1403_v15 = vadd.f32 %v3290_v24, %v1209_v12  ;;  %v1438_v36 = vpop.f32.mrb[33].mxu0  ;;  %v551_v5 = vld [vmem:[#allocation2 + $0xf0] sm:$0xff] }
 0x1ab   : > { %1595 = vst [vmem:[#allocation2 + $0x80] sm:$0xff] %v1531_v4  ;;  %v1533_v18 = vadd.f32 %v1401_v10, %v539_v8  ;;  %v3311_v39 = vpop.f32.mrb[34].mxu0  ;;  %v552_v8 = vld [vmem:[#allocation2 + $0xf8] sm:$0xff] }
 0x1ac   : > { %1596 = vst [vmem:[#allocation2 + $0x88] sm:$0xff] %v1532_v14  ;;  %v1534_v17 = vadd.f32 %v1403_v15, %v540_v11  ;;  %v3313_v41 = vpop.f32.mrb[35].mxu0 }
 0x1ad   : > { %1597 = vst [vmem:[#allocation2 + $0x90] sm:$0xff] %v1533_v18 }
 0x1ae   : > { %1598 = vst [vmem:[#allocation2 + $0x98] sm:$0xff] %v1534_v17  ;;  %v1213_v23 = vpop.f32.mrb[20].mxu1 }
 0x1af   : > { %v1407_v22 = vadd.f32 %v1406_v37, %v1213_v23  ;;  %v1215_v26 = vpop.f32.mrb[21].mxu1 }
 0x1b0   : > { %v1409_v27 = vadd.f32 %v1408_v40, %v1215_v26  ;;  %v1217_v29 = vpop.f32.mrb[22].mxu1  ;;  %v545_v40 = vld [vmem:[#allocation2 + $0xc0] sm:$0xff] }
 0x1b1   : > { %v1535_v24 = vadd.f32 %v1407_v22, %v541_v20  ;;  %v1411_v30 = vadd.f32 %v3293_v42, %v1217_v29  ;;  %v1219_v32 = vpop.f32.mrb[23].mxu1  ;;  %v1446_v48 = vpop.f32.mrb[36].mxu0  ;;  %v554_v20 = vld [vmem:[#allocation2 + $0x108] sm:$0xff] }
 0x1b2   : > { %v1536_v34 = vadd.f32 %v1409_v27, %v542_v25  ;;  %v1413_v35 = vadd.f32 %v3295_v44, %v1219_v32  ;;  %v1448_v55 = vpop.f32.mrb[37].mxu0  ;;  %v555_v25 = vld [vmem:[#allocation2 + $0x110] sm:$0xff] }
 0x1b3   : > { %1599 = vst [vmem:[#allocation2 + $0xa0] sm:$0xff] %v1535_v24  ;;  %v1537_v38 = vadd.f32 %v1411_v30, %v543_v28  ;;  %v3317_v58 = vpop.f32.mrb[38].mxu0  ;;  %v556_v28 = vld [vmem:[#allocation2 + $0x118] sm:$0xff] }
 0x1b4   : > { %1600 = vst [vmem:[#allocation2 + $0xa8] sm:$0xff] %v1536_v34  ;;  %v1538_v37 = vadd.f32 %v1413_v35, %v544_v31  ;;  %v3319_v61 = vpop.f32.mrb[39].mxu0 }
 0x1b5   : > { %1601 = vst [vmem:[#allocation2 + $0xb0] sm:$0xff] %v1537_v38 }
 0x1b6   : > { %1602 = vst [vmem:[#allocation2 + $0xb8] sm:$0xff] %v1538_v37  ;;  %v1223_v43 = vpop.f32.mrb[24].mxu1 }
 0x1b7   : > { %v1417_v42 = vadd.f32 %v1416_v56, %v1223_v43  ;;  %v1225_v46 = vpop.f32.mrb[25].mxu1 }
 0x1b8   : > { %v1419_v47 = vadd.f32 %v1418_v59, %v1225_v46  ;;  %v1227_v49 = vpop.f32.mrb[26].mxu1  ;;  %v549_v59 = vld [vmem:[#allocation2 + $0xe0] sm:$0xff] }
 0x1b9   : > { %v1539_v44 = vadd.f32 %v1417_v42, %v545_v40  ;;  %v1421_v50 = vadd.f32 %v3299_v62, %v1227_v49  ;;  %v1229_v52 = vpop.f32.mrb[27].mxu1  ;;  %v1456_v4 = vpop.f32.mrb[40].mxu0  ;;  %v558_v40 = vld [vmem:[#allocation2 + $0x128] sm:$0xff] }
 0x1ba   : > { %v1540_v53 = vadd.f32 %v1419_v47, %v546_v45  ;;  %v1423_v54 = vadd.f32 %v3301_v0, %v1229_v52  ;;  %v1458_v12 = vpop.f32.mrb[41].mxu0  ;;  %v559_v45 = vld [vmem:[#allocation2 + $0x130] sm:$0xff] }
 0x1bb   : > { %1603 = vst [vmem:[#allocation2 + $0xc0] sm:$0xff] %v1539_v44  ;;  %v1541_v57 = vadd.f32 %v1421_v50, %v547_v3  ;;  %v3323_v15 = vpop.f32.mrb[42].mxu0  ;;  %v560_v3 = vld [vmem:[#allocation2 + $0x138] sm:$0xff] }
 0x1bc   : > { %1604 = vst [vmem:[#allocation2 + $0xc8] sm:$0xff] %v1540_v53  ;;  %v1542_v56 = vadd.f32 %v1423_v54, %v548_v51  ;;  %v3325_v18 = vpop.f32.mrb[43].mxu0 }
 0x1bd   : > { %1605 = vst [vmem:[#allocation2 + $0xd0] sm:$0xff] %v1541_v57 }
 0x1be   : > { %1606 = vst [vmem:[#allocation2 + $0xd8] sm:$0xff] %v1542_v56  ;;  %v1233_v60 = vpop.f32.mrb[28].mxu1 }
 0x1bf   : > { %v1427_v62 = vadd.f32 %v1426_v13, %v1233_v60  ;;  %v1235_v2 = vpop.f32.mrb[29].mxu1 }
 0x1c0   : > { %v1429_v1 = vadd.f32 %v1428_v16, %v1235_v2  ;;  %v1237_v6 = vpop.f32.mrb[30].mxu1  ;;  %v553_v16 = vld [vmem:[#allocation2 + $0x100] sm:$0xff] }
 0x1c1   : > { %v1543_v0 = vadd.f32 %v1427_v62, %v549_v59  ;;  %v1431_v7 = vadd.f32 %v3305_v19, %v1237_v6  ;;  %v1239_v9 = vpop.f32.mrb[31].mxu1  ;;  %v1466_v24 = vpop.f32.mrb[44].mxu0  ;;  %v562_v59 = vld [vmem:[#allocation2 + $0x148] sm:$0xff] }
 0x1c2   : > { %v1544_v10 = vadd.f32 %v1429_v1, %v550_v63  ;;  %v1433_v11 = vadd.f32 %v3307_v21, %v1239_v9  ;;  %v1468_v32 = vpop.f32.mrb[45].mxu0  ;;  %v563_v63 = vld [vmem:[#allocation2 + $0x150] sm:$0xff] }
 0x1c3   : > { %1607 = vst [vmem:[#allocation2 + $0xe0] sm:$0xff] %v1543_v0  ;;  %v1545_v14 = vadd.f32 %v1431_v7, %v551_v5  ;;  %v3329_v35 = vpop.f32.mrb[46].mxu0  ;;  %v564_v5 = vld [vmem:[#allocation2 + $0x158] sm:$0xff] }
 0x1c4   : > { %1608 = vst [vmem:[#allocation2 + $0xe8] sm:$0xff] %v1544_v10  ;;  %v1546_v13 = vadd.f32 %v1433_v11, %v552_v8  ;;  %v3331_v38 = vpop.f32.mrb[47].mxu0 }
 0x1c5   : > { %1609 = vst [vmem:[#allocation2 + $0xf0] sm:$0xff] %v1545_v14 }
 0x1c6   : > { %1610 = vst [vmem:[#allocation2 + $0xf8] sm:$0xff] %v1546_v13  ;;  %v1243_v17 = vpop.f32.mrb[32].mxu1 }
 0x1c7   : > { %v1437_v19 = vadd.f32 %v1436_v33, %v1243_v17  ;;  %v1245_v23 = vpop.f32.mrb[33].mxu1 }
 0x1c8   : > { %v1439_v22 = vadd.f32 %v1438_v36, %v1245_v23  ;;  %v1247_v26 = vpop.f32.mrb[34].mxu1  ;;  %v557_v36 = vld [vmem:[#allocation2 + $0x120] sm:$0xff] }
 0x1c9   : > { %v1547_v21 = vadd.f32 %v1437_v19, %v553_v16  ;;  %v1441_v27 = vadd.f32 %v3311_v39, %v1247_v26  ;;  %v1249_v29 = vpop.f32.mrb[35].mxu1  ;;  %v1476_v44 = vpop.f32.mrb[48].mxu0  ;;  %v566_v16 = vld [vmem:[#allocation2 + $0x168] sm:$0xff] }
 0x1ca   : > { %v1548_v30 = vadd.f32 %v1439_v22, %v554_v20  ;;  %v1443_v31 = vadd.f32 %v3313_v41, %v1249_v29  ;;  %v1478_v52 = vpop.f32.mrb[49].mxu0  ;;  %v567_v20 = vld [vmem:[#allocation2 + $0x170] sm:$0xff] }
 0x1cb   : > { %1611 = vst [vmem:[#allocation2 + $0x100] sm:$0xff] %v1547_v21  ;;  %v1549_v34 = vadd.f32 %v1441_v27, %v555_v25  ;;  %v3335_v54 = vpop.f32.mrb[50].mxu0  ;;  %v568_v25 = vld [vmem:[#allocation2 + $0x178] sm:$0xff] }
 0x1cc   : > { %1612 = vst [vmem:[#allocation2 + $0x108] sm:$0xff] %v1548_v30  ;;  %v1550_v33 = vadd.f32 %v1443_v31, %v556_v28  ;;  %v3337_v57 = vpop.f32.mrb[51].mxu0 }
 0x1cd   : > { %1613 = vst [vmem:[#allocation2 + $0x110] sm:$0xff] %v1549_v34 }
 0x1ce   : > { %1614 = vst [vmem:[#allocation2 + $0x118] sm:$0xff] %v1550_v33  ;;  %v1253_v37 = vpop.f32.mrb[36].mxu1 }
 0x1cf   : > { %v1447_v39 = vadd.f32 %v1446_v48, %v1253_v37  ;;  %v1255_v43 = vpop.f32.mrb[37].mxu1  ;;  %v570_v37 = vld [vmem:[#allocation2 + $0x188] sm:$0xff] }
 0x1d0   : > { %v1449_v42 = vadd.f32 %v1448_v55, %v1255_v43  ;;  %v1257_v46 = vpop.f32.mrb[38].mxu1  ;;  %v561_v55 = vld [vmem:[#allocation2 + $0x140] sm:$0xff] }
 0x1d1   : > { %v1551_v41 = vadd.f32 %v1447_v39, %v557_v36  ;;  %v1451_v47 = vadd.f32 %v3317_v58, %v1257_v46  ;;  %v1259_v49 = vpop.f32.mrb[39].mxu1  ;;  %v1486_v0 = vpop.f32.mrb[52].mxu0 }
 0x1d2   : > { %v1552_v50 = vadd.f32 %v1449_v42, %v558_v40  ;;  %v1453_v51 = vadd.f32 %v3319_v61, %v1259_v49  ;;  %v1488_v9 = vpop.f32.mrb[53].mxu0  ;;  %v571_v40 = vld [vmem:[#allocation2 + $0x190] sm:$0xff] }
 0x1d3   : > { %1615 = vst [vmem:[#allocation2 + $0x120] sm:$0xff] %v1551_v41  ;;  %v1553_v53 = vadd.f32 %v1451_v47, %v559_v45  ;;  %v3341_v11 = vpop.f32.mrb[54].mxu0  ;;  %v572_v45 = vld [vmem:[#allocation2 + $0x198] sm:$0xff] }
 0x1d4   : > { %1616 = vst [vmem:[#allocation2 + $0x128] sm:$0xff] %v1552_v50  ;;  %v1554_v48 = vadd.f32 %v1453_v51, %v560_v3  ;;  %v3343_v14 = vpop.f32.mrb[55].mxu0 }
 0x1d5   : > { %1617 = vst [vmem:[#allocation2 + $0x130] sm:$0xff] %v1553_v53 }
 0x1d6   : > { %1618 = vst [vmem:[#allocation2 + $0x138] sm:$0xff] %v1554_v48  ;;  %v1263_v56 = vpop.f32.mrb[40].mxu1 }
 0x1d7   : > { %v1457_v58 = vadd.f32 %v1456_v4, %v1263_v56  ;;  %v1265_v60 = vpop.f32.mrb[41].mxu1  ;;  %v574_v56 = vld [vmem:[#allocation2 + $0x1a8] sm:$0xff] }
 0x1d8   : > { %v1459_v62 = vadd.f32 %v1458_v12, %v1265_v60  ;;  %v1267_v2 = vpop.f32.mrb[42].mxu1  ;;  %v565_v12 = vld [vmem:[#allocation2 + $0x160] sm:$0xff] }
 0x1d9   : > { %v1555_v61 = vadd.f32 %v1457_v58, %v561_v55  ;;  %v1461_v1 = vadd.f32 %v3323_v15, %v1267_v2  ;;  %v1269_v6 = vpop.f32.mrb[43].mxu1  ;;  %v1496_v21 = vpop.f32.mrb[56].mxu0 }
 0x1da   : > { %v1556_v7 = vadd.f32 %v1459_v62, %v562_v59  ;;  %v1463_v8 = vadd.f32 %v3325_v18, %v1269_v6  ;;  %v1498_v29 = vpop.f32.mrb[57].mxu0  ;;  %v575_v59 = vld [vmem:[#allocation2 + $0x1b0] sm:$0xff] }
 0x1db   : > { %1619 = vst [vmem:[#allocation2 + $0x140] sm:$0xff] %v1555_v61  ;;  %v1557_v10 = vadd.f32 %v1461_v1, %v563_v63  ;;  %v1500_v31 = vpop.f32.mrb[58].mxu0  ;;  %v576_v63 = vld [vmem:[#allocation2 + $0x1b8] sm:$0xff] }
 0x1dc   : > { %1620 = vst [vmem:[#allocation2 + $0x148] sm:$0xff] %v1556_v7  ;;  %v1558_v4 = vadd.f32 %v1463_v8, %v564_v5  ;;  %v1502_v34 = vpop.f32.mrb[59].mxu0 }
 0x1dd   : > { %1621 = vst [vmem:[#allocation2 + $0x150] sm:$0xff] %v1557_v10 }
 0x1de   : > { %1622 = vst [vmem:[#allocation2 + $0x158] sm:$0xff] %v1558_v4  ;;  %v1273_v13 = vpop.f32.mrb[44].mxu1 }
 0x1df   : > { %v1467_v15 = vadd.f32 %v1466_v24, %v1273_v13  ;;  %v1275_v17 = vpop.f32.mrb[45].mxu1 }
 0x1e0   : > { %v1469_v19 = vadd.f32 %v1468_v32, %v1275_v17  ;;  %v1277_v23 = vpop.f32.mrb[46].mxu1  ;;  %v569_v32 = vld [vmem:[#allocation2 + $0x180] sm:$0xff] }
 0x1e1   : > { %v1559_v18 = vadd.f32 %v1467_v15, %v565_v12  ;;  %v1471_v22 = vadd.f32 %v3329_v35, %v1277_v23  ;;  %v1279_v26 = vpop.f32.mrb[47].mxu1  ;;  %v1506_v41 = vpop.f32.mrb[60].mxu0  ;;  %v579_v12 = vld [vmem:[#allocation2 + $0x1d0] sm:$0xff] }
 0x1e2   : > { %v1560_v27 = vadd.f32 %v1469_v19, %v566_v16  ;;  %v1473_v28 = vadd.f32 %v3331_v38, %v1279_v26  ;;  %v1508_v49 = vpop.f32.mrb[61].mxu0  ;;  %v580_v16 = vld [vmem:[#allocation2 + $0x1d8] sm:$0xff]  ;;  %v582_v26 = vld [vmem:[#allocation2 + $0x1e8] sm:$0xff] }
 0x1e3   : > { %1623 = vst [vmem:[#allocation2 + $0x160] sm:$0xff] %v1559_v18  ;;  %v1561_v30 = vadd.f32 %v1471_v22, %v567_v20  ;;  %v1510_v51 = vpop.f32.mrb[62].mxu0  ;;  %v581_v18 = vld [vmem:[#allocation2 + $0x1e0] sm:$0xff] }
 0x1e4   : > { %1624 = vst [vmem:[#allocation2 + $0x168] sm:$0xff] %v1560_v27  ;;  %v1562_v24 = vadd.f32 %v1473_v28, %v568_v25  ;;  %v1512_v53 = vpop.f32.mrb[63].mxu0  ;;  %v583_v28 = vld [vmem:[#allocation2 + $0x1f0] sm:$0xff] }
 0x1e5   : > { %1625 = vst [vmem:[#allocation2 + $0x170] sm:$0xff] %v1561_v30 }
 0x1e6   : > { %1626 = vst [vmem:[#allocation2 + $0x178] sm:$0xff] %v1562_v24  ;;  %v1283_v33 = vpop.f32.mrb[48].mxu1  ;;  %v584_v24 = vld [vmem:[#allocation2 + $0x1f8] sm:$0xff] }
 0x1e7   : > { %v1477_v36 = vadd.f32 %v1476_v44, %v1283_v33  ;;  %v1285_v35 = vpop.f32.mrb[49].mxu1 }
 0x1e8   : > { %v1479_v39 = vadd.f32 %v1478_v52, %v1285_v35  ;;  %v1287_v43 = vpop.f32.mrb[50].mxu1  ;;  %v573_v52 = vld [vmem:[#allocation2 + $0x1a0] sm:$0xff]  ;;  %v1713_v35 = vlaneseq (!%p2392_p12) }
 0x1e9   : > { %v1563_v42 = vadd.f32 %v1477_v36, %v569_v32  ;;  %v1481_v38 = vadd.f32 %v3335_v54, %v1287_v43  ;;  %v1289_v46 = vpop.f32.mrb[51].mxu1  ;;  %v1787_v43 = vld [vmem:[%s3543_s3] sm:$0x3] (!%p2392_p12) }
 0x1ea   : > { %v1564_v47 = vadd.f32 %v1479_v39, %v570_v37  ;;  %v1483_v3 = vadd.f32 %v3337_v57, %v1289_v46  ;;  %v1714_v39 = vshrl.u32 (!%p2392_p12), %v1713_v35, 7 }
 0x1eb   : > { %1627 = vst [vmem:[#allocation2 + $0x180] sm:$0xff] %v1563_v42  ;;  %v1565_v50 = vadd.f32 %v1481_v38, %v571_v40  ;;  %v1711_v40 = vld [vmem:[%s3542_s2] sm:$0x3] (!%p2392_p12)  ;;  %v1648_v38 = vld [vmem:[#allocation2 + $0x8] sm:$0xff] (!%p2392_p12) }
 0x1ec   : > { %1628 = vst [vmem:[#allocation2 + $0x188] sm:$0xff] %v1564_v47  ;;  %v1566_v44 = vadd.f32 %v1483_v3, %v572_v45  ;;  %v1647_v42 = vld [vmem:[#allocation2] sm:$0xff] (!%p2392_p12)  ;;  %v1715_v45 = vsub.s32 (!%p2392_p12), 0, %v1714_v39  ;;  %v1719_v46 = vsub.s32 (!%p2392_p12), 1, %v1714_v39  ;;  %v1650_v47 = vld [vmem:[#allocation2 + $0x18] sm:$0xff] (!%p2392_p12) }
 0x1ed   : > { %1629 = vst [vmem:[#allocation2 + $0x190] sm:$0xff] %v1565_v50  ;;  %v1651_v3 = vld [vmem:[#allocation2 + $0x20] sm:$0xff] (!%p2392_p12) }
 0x1ee   : > { %1630 = vst [vmem:[#allocation2 + $0x198] sm:$0xff] %v1566_v44  ;;  %v1293_v48 = vpop.f32.mrb[52].mxu1  ;;  %v3360_v50 = vrot.slane (!%p2392_p12), %v1711_v40, %v1719_v46  ;;  %v3364_v44 = vrot.slane (!%p2392_p12), %v1787_v43, %v1719_v46  ;;  %v1664_v46 = vld [vmem:[#allocation2 + $0x88] sm:$0xff] (!%p2392_p12) }
 0x1ef   : > { %v1487_v55 = vadd.f32 %v1486_v0, %v1293_v48  ;;  %v1295_v54 = vpop.f32.mrb[53].mxu1  ;;  %v577_v0 = vld [vmem:[#allocation2 + $0x1c0] sm:$0xff]  ;;  %v1654_v48 = vld [vmem:[#allocation2 + $0x38] sm:$0xff] (!%p2392_p12) }
 0x1f0   : > { %v1489_v58 = vadd.f32 %v1488_v9, %v1295_v54  ;;  %v1297_v60 = vpop.f32.mrb[54].mxu1  ;;  %v578_v9 = vld [vmem:[#allocation2 + $0x1c8] sm:$0xff] }
 0x1f1   : > { %v1567_v62 = vadd.f32 %v1487_v55, %v573_v52  ;;  %v1491_v57 = vadd.f32 %v3341_v11, %v1297_v60  ;;  %v1299_v2 = vpop.f32.mrb[55].mxu1  ;;  %v1653_v52 = vld [vmem:[#allocation2 + $0x30] sm:$0xff] (!%p2392_p12) }
 0x1f2   : > { %v1568_v61 = vadd.f32 %v1489_v58, %v574_v56  ;;  %v1493_v1 = vadd.f32 %v3343_v14, %v1299_v2  ;;  %v1724_v56 = vmul.f32 (!%p2392_p12), %v3360_v50, %v1648_v38  ;;  %v1726_v58 = vmul.f32 (!%p2392_p12), %v3360_v50, %v1650_v47 }
 0x1f3   : > { %1631 = vst [vmem:[#allocation2 + $0x1a0] sm:$0xff] %v1567_v62  ;;  %v1569_v5 = vadd.f32 %v1491_v57, %v575_v59  ;;  %v1730_v57 = vmul.f32 (!%p2392_p12), %v3360_v50, %v1654_v48  ;;  %v1666_v48 = vld [vmem:[#allocation2 + $0x98] sm:$0xff] (!%p2392_p12) }
 0x1f4   : > { %1632 = vst [vmem:[#allocation2 + $0x1a8] sm:$0xff] %v1568_v61  ;;  %v1570_v6 = vadd.f32 %v1493_v1, %v576_v63  ;;  %v1800_v2 = vadd.f32 (!%p2392_p12), %v3364_v44, %v1724_v56  ;;  %v1802_v1 = vadd.f32 (!%p2392_p12), %v3364_v44, %v1726_v58 }
 0x1f5   : > { %1633 = vst [vmem:[#allocation2 + $0x1b0] sm:$0xff] %v1569_v5 }
 0x1f6   : > { %1634 = vst [vmem:[#allocation2 + $0x1b8] sm:$0xff] %v1570_v6  ;;  %v1303_v7 = vpop.f32.mrb[56].mxu1 }
 0x1f7   : > { %v1497_v8 = vadd.f32 %v1496_v21, %v1303_v7  ;;  %v1305_v10 = vpop.f32.mrb[57].mxu1  ;;  %v1806_v7 = vadd.f32 (!%p2392_p12), %v3364_v44, %v1730_v57 }
 0x1f8   : > { %v1499_v4 = vadd.f32 %v1498_v29, %v1305_v10  ;;  %v1307_v13 = vpop.f32.mrb[58].mxu1 }
 0x1f9   : > { %v1571_v11 = vadd.f32 %v1497_v8, %v577_v0  ;;  %v1501_v15 = vadd.f32 %v1500_v31, %v1307_v13  ;;  %v1309_v17 = vpop.f32.mrb[59].mxu1  ;;  %v1655_v8 = vld [vmem:[#allocation2 + $0x40] sm:$0xff] (!%p2392_p12)  ;;  %v1866_v13 = vmax.f32 (!%p2392_p12), %v1802_v1, 0.0 }
 0x1fa   : > { %v1572_v19 = vadd.f32 %v1499_v4, %v578_v9  ;;  %v1503_v14 = vadd.f32 %v1502_v34, %v1309_v17  ;;  %v1656_v9 = vld [vmem:[#allocation2 + $0x48] sm:$0xff] (!%p2392_p12)  ;;  %v1864_v4 = vmax.f32 (!%p2392_p12), %v1800_v2, 0.0  ;;  %v1740_v2 = vmul.f32 (!%p2392_p12), %v3360_v50, %v1664_v46 }
 0x1fb   : > { %1635 = vst [vmem:[#allocation2 + $0x1c0] sm:$0xff] %v1571_v11  ;;  %v1573_v20 = vadd.f32 %v1501_v15, %v579_v12  ;;  %v1657_v11 = vld [vmem:[#allocation2 + $0x50] sm:$0xff] (!%p2392_p12)  ;;  %v1658_v15 = vld [vmem:[#allocation2 + $0x58] sm:$0xff] (!%p2392_p12) }
 0x1fc   : > { %1636 = vst [vmem:[#allocation2 + $0x1c8] sm:$0xff] %v1572_v19  ;;  %v1574_v23 = vadd.f32 %v1503_v14, %v580_v16  ;;  %v1870_v14 = vmax.f32 (!%p2392_p12), %v1806_v7, 0.0  ;;  %v1670_v7 = vld [vmem:[#allocation2 + $0xb8] sm:$0xff] (!%p2392_p12) }
 0x1fd   : > { %1637 = vst [vmem:[#allocation2 + $0x1d0] sm:$0xff] %v1573_v20  ;;  %v1659_v20 = vld [vmem:[#allocation2 + $0x60] sm:$0xff] (!%p2392_p12) }
 0x1fe   : > { %1638 = vst [vmem:[#allocation2 + $0x1d8] sm:$0xff] %v1574_v23  ;;  %v1313_v22 = vpop.f32.mrb[60].mxu1  ;;  %v1660_v23 = vld [vmem:[#allocation2 + $0x68] sm:$0xff] (!%p2392_p12) }
 0x1ff   : > { %v1507_v25 = vadd.f32 %v1506_v41, %v1313_v22  ;;  %v1315_v21 = vpop.f32.mrb[61].mxu1  ;;  %v1649_v41 = vld [vmem:[#allocation2 + $0x10] sm:$0xff] (!%p2392_p12) }
 0x200   : > { %v1509_v27 = vadd.f32 %v1508_v49, %v1315_v21  ;;  %v1317_v29 = vpop.f32.mrb[62].mxu1  ;;  %1646 = sbr.rel (%p2392_p12) target bundleno = 573 (0x23d), region = 52  ;;  %v3358_v49 = vrot.slane (!%p2392_p12), %v1711_v40, %v1715_v45  ;;  %v1661_v21 = vld [vmem:[#allocation2 + $0x70] sm:$0xff] (!%p2392_p12)  ;;  %v1663_v40 = vld [vmem:[#allocation2 + $0x80] sm:$0xff] (!%p2392_p12) }
 0x201   : > { %v1575_v30 = vadd.f32 %v1507_v25, %v581_v18  ;;  %v1511_v31 = vadd.f32 %v1510_v51, %v1317_v29  ;;  %v1319_v32 = vpop.f32.mrb[63].mxu1  ;;  %v3362_v51 = vrot.slane (!%p2392_p12), %v1787_v43, %v1715_v45 }
 0x202   : > { %v1576_v33 = vadd.f32 %v1509_v27, %v582_v26  ;;  %v1513_v34 = vadd.f32 %v1512_v53, %v1319_v32  ;;  %v1652_v53 = vld [vmem:[#allocation2 + $0x28] sm:$0xff] (!%p2392_p12)  ;;  %v1723_v55 = vmul.f32 (!%p2392_p12), %v3358_v49, %v1647_v42  ;;  %v1725_v54 = vmul.f32 (!%p2392_p12), %v3358_v49, %v1649_v41  ;;  %v1662_v27 = vld [vmem:[#allocation2 + $0x78] sm:$0xff] (!%p2392_p12) }
 0x203   : > { %1639 = vst [vmem:[#allocation2 + $0x1e0] sm:$0xff] %v1575_v30  ;;  %v1577_v36 = vadd.f32 %v1511_v31, %v583_v28  ;;  %v1727_v59 = vmul.f32 (!%p2392_p12), %v3358_v49, %v1651_v3  ;;  %v1728_v60 = vmul.f32 (!%p2392_p12), %v3360_v50, %v1652_v53  ;;  %v1729_v62 = vmul.f32 (!%p2392_p12), %v3358_v49, %v1653_v52  ;;  %v1665_v52 = vld [vmem:[#allocation2 + $0x90] sm:$0xff] (!%p2392_p12) }
 0x204   : > { %1640 = vst [vmem:[#allocation2 + $0x1e8] sm:$0xff] %v1576_v33  ;;  %v1578_v37 = vadd.f32 %v1513_v34, %v584_v24  ;;  %v1799_v63 = vadd.f32 (!%p2392_p12), %v3362_v51, %v1723_v55  ;;  %v1801_v61 = vadd.f32 (!%p2392_p12), %v3362_v51, %v1725_v54  ;;  %v1731_v25 = vmul.f32 (!%p2392_p12), %v3358_v49, %v1655_v8 }
 0x205   : > { %1641 = vst [vmem:[#allocation2 + $0x1f0] sm:$0xff] %v1577_v36  ;;  %v1803_v5 = vadd.f32 (!%p2392_p12), %v3362_v51, %v1727_v59  ;;  %v1804_v6 = vadd.f32 (!%p2392_p12), %v3364_v44, %v1728_v60  ;;  %v1805_v0 = vadd.f32 (!%p2392_p12), %v3362_v51, %v1729_v62  ;;  %v1732_v26 = vmul.f32 (!%p2392_p12), %v3360_v50, %v1656_v9  ;;  %v1667_v59 = vld [vmem:[#allocation2 + $0xa0] sm:$0xff] (!%p2392_p12)  ;;  %v1668_v60 = vld [vmem:[#allocation2 + $0xa8] sm:$0xff] (!%p2392_p12) }
 0x206   : > { %1642 = vst [vmem:[#allocation2 + $0x1f8] sm:$0xff] %v1578_v37  ;;  %v1863_v10 = vmax.f32 (!%p2392_p12), %v1799_v63, 0.0  ;;  %v1865_v12 = vmax.f32 (!%p2392_p12), %v1801_v61, 0.0  ;;  %v1733_v30 = vmul.f32 (!%p2392_p12), %v3358_v49, %v1657_v11  ;;  %v1734_v31 = vmul.f32 (!%p2392_p12), %v3360_v50, %v1658_v15  ;;  %v1669_v61 = vld [vmem:[#allocation2 + $0xb0] sm:$0xff] (!%p2392_p12) }
 0x207   : > { %v1867_v16 = vmax.f32 %v1803_v5, 0.0  ;;  %v1868_v17 = vmax.f32 %v1804_v6, 0.0  ;;  %v1869_v19 = vmax.f32 %v1805_v0, 0.0  ;;  %v1807_v24 = vadd.f32 %v3362_v51, %v1731_v25 }
 0x208   : > { %v2432_v18 = vpack.c.bf16 %v1864_v4, %v1863_v10  ;;  %v2433_v22 = vpack.c.bf16 %v1866_v13, %v1865_v12  ;;  %v1808_v32 = vadd.f32 %v3364_v44, %v1732_v26  ;;  %v1735_v33 = vmul.f32 %v3358_v49, %v1659_v20  ;;  %v1671_v12 = vld [vmem:[#allocation2 + $0xc0] sm:$0xff] }
 0x209   : > { %v2434_v28 = vpack.c.bf16 %v1868_v17, %v1867_v16  ;;  %v2435_v29 = vpack.c.bf16 %v1870_v14, %v1869_v19  ;;  %v1736_v34 = vmul.f32 %v3360_v50, %v1660_v23  ;;  %v1809_v36 = vadd.f32 %v3362_v51, %v1733_v30  ;;  %v1672_v23 = vld [vmem:[#allocation2 + $0xc8] sm:$0xff] }
 0x20a   : > { %2119 = vst [vmem:[#allocation8] sm:$0xff] %v2432_v18  ;;  %2120 = vst [vmem:[#allocation8 + $0x8] sm:$0xff] %v2433_v22  ;;  %v1810_v37 = vadd.f32 %v3364_v44, %v1734_v31  ;;  %v1737_v35 = vmul.f32 %v3358_v49, %v1661_v21  ;;  %v1738_v39 = vmul.f32 %v3360_v50, %v1662_v27  ;;  %v1871_v43 = vmax.f32 %v1807_v24, 0.0  ;;  %v1673_v21 = vld [vmem:[#allocation2 + $0xd0] sm:$0xff]  ;;  %v1674_v27 = vld [vmem:[#allocation2 + $0xd8] sm:$0xff] }
 0x20b   : > { %2121 = vst [vmem:[#allocation8 + $0x10] sm:$0xff] %v2434_v28  ;;  %2122 = vst [vmem:[#allocation8 + $0x18] sm:$0xff] %v2435_v29  ;;  %v1872_v42 = vmax.f32 %v1808_v32, 0.0  ;;  %v1811_v38 = vadd.f32 %v3362_v51, %v1735_v33  ;;  %v1812_v45 = vadd.f32 %v3364_v44, %v1736_v34  ;;  %v1873_v41 = vmax.f32 %v1809_v36, 0.0  ;;  %v1675_v24 = vld [vmem:[#allocation2 + $0xe0] sm:$0xff]  ;;  %v1676_v32 = vld [vmem:[#allocation2 + $0xe8] sm:$0xff] }
 0x20c   : > { %v1874_v47 = vmax.f32 %v1810_v37, 0.0  ;;  %v1813_v3 = vadd.f32 %v3362_v51, %v1737_v35  ;;  %v1814_v53 = vadd.f32 %v3364_v44, %v1738_v39  ;;  %v1739_v58 = vmul.f32 %v3358_v49, %v1663_v40  ;;  %v1677_v35 = vld [vmem:[#allocation2 + $0xf0] sm:$0xff] }
 0x20d   : > { %v2436_v55 = vpack.c.bf16 %v1872_v42, %v1871_v43  ;;  %v1875_v56 = vmax.f32 %v1811_v38, 0.0  ;;  %v1876_v54 = vmax.f32 %v1812_v45, 0.0  ;;  %v1741_v6 = vmul.f32 %v3358_v49, %v1665_v52  ;;  %v1678_v38 = vld [vmem:[#allocation2 + $0xf8] sm:$0xff] }
 0x20e   : > { %v2437_v62 = vpack.c.bf16 %v1874_v47, %v1873_v41  ;;  %v1877_v57 = vmax.f32 %v1813_v3, 0.0  ;;  %v1878_v63 = vmax.f32 %v1814_v53, 0.0  ;;  %v1815_v5 = vadd.f32 %v3362_v51, %v1739_v58  ;;  %v1679_v3 = vld [vmem:[#allocation2 + $0x100] sm:$0xff] }
 0x20f   : > { %2123 = vst [vmem:[#allocation8 + $0x20] sm:$0xff] %v2436_v55  ;;  %v2438_v1 = vpack.c.bf16 %v1876_v54, %v1875_v56  ;;  %v1742_v0 = vmul.f32 %v3360_v50, %v1666_v48  ;;  %v1816_v9 = vadd.f32 %v3364_v44, %v1740_v2  ;;  %v1743_v10 = vmul.f32 %v3358_v49, %v1667_v59 }
 0x210   : > { %2124 = vst [vmem:[#allocation8 + $0x28] sm:$0xff] %v2437_v62  ;;  %v2439_v8 = vpack.c.bf16 %v1878_v63, %v1877_v57  ;;  %v1744_v4 = vmul.f32 %v3360_v50, %v1668_v60  ;;  %v1879_v13 = vmax.f32 %v1815_v5, 0.0  ;;  %v1817_v11 = vadd.f32 %v3362_v51, %v1741_v6  ;;  %v1680_v60 = vld [vmem:[#allocation2 + $0x108] sm:$0xff] }
 0x211   : > { %2125 = vst [vmem:[#allocation8 + $0x30] sm:$0xff] %v2438_v1  ;;  %v1818_v15 = vadd.f32 %v3364_v44, %v1742_v0  ;;  %v1745_v16 = vmul.f32 %v3358_v49, %v1669_v61  ;;  %v1880_v17 = vmax.f32 %v1816_v9, 0.0  ;;  %v1819_v19 = vadd.f32 %v3362_v51, %v1743_v10  ;;  %v1681_v61 = vld [vmem:[#allocation2 + $0x110] sm:$0xff]  ;;  %v1682_v1 = vld [vmem:[#allocation2 + $0x118] sm:$0xff]  ;;  %v1684_v9 = vld [vmem:[#allocation2 + $0x128] sm:$0xff] }
 0x212   : > { %2126 = vst [vmem:[#allocation8 + $0x38] sm:$0xff] %v2439_v8  ;;  %v1820_v14 = vadd.f32 %v3364_v44, %v1744_v4  ;;  %v1746_v20 = vmul.f32 %v3360_v50, %v1670_v7  ;;  %v1881_v18 = vmax.f32 %v1817_v11, 0.0  ;;  %v1747_v26 = vmul.f32 %v3358_v49, %v1671_v12  ;;  %v1683_v8 = vld [vmem:[#allocation2 + $0x120] sm:$0xff]  ;;  %v1685_v11 = vld [vmem:[#allocation2 + $0x130] sm:$0xff] }
 0x213   : > { %v1882_v22 = vmax.f32 %v1818_v15, 0.0  ;;  %v1821_v25 = vadd.f32 %v3362_v51, %v1745_v16  ;;  %v2440_v28 = vpack.c.bf16 %v1880_v17, %v1879_v13  ;;  %v1883_v29 = vmax.f32 %v1819_v19, 0.0 }
 0x214   : > { %v1884_v30 = vmax.f32 %v1820_v14, 0.0  ;;  %v1822_v31 = vadd.f32 %v3364_v44, %v1746_v20  ;;  %v1748_v36 = vmul.f32 %v3360_v50, %v1672_v23  ;;  %v1823_v37 = vadd.f32 %v3362_v51, %v1747_v26  ;;  %v1686_v14 = vld [vmem:[#allocation2 + $0x138] sm:$0xff] }
 0x215   : > { %v2441_v33 = vpack.c.bf16 %v1882_v22, %v1881_v18  ;;  %v1885_v34 = vmax.f32 %v1821_v25, 0.0  ;;  %2127 = vst [vmem:[#allocation8 + $0x40] sm:$0xff] %v2440_v28  ;;  %v1749_v43 = vmul.f32 %v3358_v49, %v1673_v21  ;;  %v1750_v42 = vmul.f32 %v3360_v50, %v1674_v27  ;;  %v1687_v25 = vld [vmem:[#allocation2 + $0x140] sm:$0xff] }
 0x216   : > { %v2442_v39 = vpack.c.bf16 %v1884_v30, %v1883_v29  ;;  %v1886_v40 = vmax.f32 %v1822_v31, 0.0  ;;  %v1824_v45 = vadd.f32 %v3364_v44, %v1748_v36  ;;  %v1887_v46 = vmax.f32 %v1823_v37, 0.0 }
 0x217   : > { %2128 = vst [vmem:[#allocation8 + $0x48] sm:$0xff] %v2441_v33  ;;  %v1751_v41 = vmul.f32 %v3358_v49, %v1675_v24  ;;  %v1752_v47 = vmul.f32 %v3360_v50, %v1676_v32  ;;  %v1825_v52 = vadd.f32 %v3362_v51, %v1749_v43  ;;  %v1826_v48 = vadd.f32 %v3364_v44, %v1750_v42  ;;  %v1688_v32 = vld [vmem:[#allocation2 + $0x148] sm:$0xff] }
 0x218   : > { %2129 = vst [vmem:[#allocation8 + $0x50] sm:$0xff] %v2442_v39  ;;  %v2443_v53 = vpack.c.bf16 %v1886_v40, %v1885_v34  ;;  %v1753_v55 = vmul.f32 %v3358_v49, %v1677_v35  ;;  %v1888_v56 = vmax.f32 %v1824_v45, 0.0  ;;  %v1754_v59 = vmul.f32 %v3360_v50, %v1678_v38  ;;  %v1689_v35 = vld [vmem:[#allocation2 + $0x150] sm:$0xff]  ;;  %v1690_v39 = vld [vmem:[#allocation2 + $0x158] sm:$0xff]  ;;  %v1691_v45 = vld [vmem:[#allocation2 + $0x160] sm:$0xff] }
 0x219   : > { %v1827_v54 = vadd.f32 %v3362_v51, %v1751_v41  ;;  %v1828_v58 = vadd.f32 %v3364_v44, %v1752_v47  ;;  %v1889_v62 = vmax.f32 %v1825_v52, 0.0  ;;  %v1890_v57 = vmax.f32 %v1826_v48, 0.0  ;;  %v1693_v52 = vld [vmem:[#allocation2 + $0x170] sm:$0xff] }
 0x21a   : > { %2130 = vst [vmem:[#allocation8 + $0x58] sm:$0xff] %v2443_v53  ;;  %v1829_v63 = vadd.f32 %v3362_v51, %v1753_v55  ;;  %v1755_v2 = vmul.f32 %v3358_v49, %v1679_v3  ;;  %v2444_v5 = vpack.c.bf16 %v1888_v56, %v1887_v46  ;;  %v1830_v7 = vadd.f32 %v3364_v44, %v1754_v59  ;;  %v1692_v46 = vld [vmem:[#allocation2 + $0x168] sm:$0xff] }
 0x21b   : > { %v1891_v6 = vmax.f32 %v1827_v54, 0.0  ;;  %v1892_v0 = vmax.f32 %v1828_v58, 0.0  ;;  %v2445_v10 = vpack.c.bf16 %v1890_v57, %v1889_v62  ;;  %v1756_v12 = vmul.f32 %v3360_v50, %v1680_v60  ;;  %v1694_v58 = vld [vmem:[#allocation2 + $0x178] sm:$0xff] }
 0x21c   : > { %v1893_v4 = vmax.f32 %v1829_v63, 0.0  ;;  %v1831_v13 = vadd.f32 %v3362_v51, %v1755_v2  ;;  %2131 = vst [vmem:[#allocation8 + $0x60] sm:$0xff] %v2444_v5  ;;  %v1894_v16 = vmax.f32 %v1830_v7, 0.0  ;;  %v1757_v17 = vmul.f32 %v3358_v49, %v1681_v61  ;;  %v1695_v63 = vld [vmem:[#allocation2 + $0x180] sm:$0xff] }
 0x21d   : > { %v2446_v15 = vpack.c.bf16 %v1892_v0, %v1891_v6  ;;  %v1758_v19 = vmul.f32 %v3360_v50, %v1682_v1  ;;  %2132 = vst [vmem:[#allocation8 + $0x68] sm:$0xff] %v2445_v10  ;;  %v1832_v20 = vadd.f32 %v3364_v44, %v1756_v12  ;;  %v1759_v18 = vmul.f32 %v3358_v49, %v1683_v8 }
 0x21e   : > { %v1895_v23 = vmax.f32 %v1831_v13, 0.0  ;;  %v1760_v22 = vmul.f32 %v3360_v50, %v1684_v9  ;;  %v2447_v26 = vpack.c.bf16 %v1894_v16, %v1893_v4  ;;  %v1833_v21 = vadd.f32 %v3362_v51, %v1757_v17  ;;  %v1696_v9 = vld [vmem:[#allocation2 + $0x188] sm:$0xff] }
 0x21f   : > { %2133 = vst [vmem:[#allocation8 + $0x70] sm:$0xff] %v2446_v15  ;;  %v1834_v27 = vadd.f32 %v3364_v44, %v1758_v19  ;;  %v1761_v28 = vmul.f32 %v3358_v49, %v1685_v11  ;;  %v1896_v29 = vmax.f32 %v1832_v20, 0.0  ;;  %v1835_v30 = vadd.f32 %v3362_v51, %v1759_v18  ;;  %v1697_v11 = vld [vmem:[#allocation2 + $0x190] sm:$0xff]  ;;  %v1698_v15 = vld [vmem:[#allocation2 + $0x198] sm:$0xff]  ;;  %v1699_v20 = vld [vmem:[#allocation2 + $0x1a0] sm:$0xff] }
 0x220   : > { %v1836_v31 = vadd.f32 %v3364_v44, %v1760_v22  ;;  %v1762_v24 = vmul.f32 %v3360_v50, %v1686_v14  ;;  %2134 = vst [vmem:[#allocation8 + $0x78] sm:$0xff] %v2447_v26  ;;  %v1897_v33 = vmax.f32 %v1833_v21, 0.0  ;;  %v1763_v37 = vmul.f32 %v3358_v49, %v1687_v25  ;;  %v1701_v21 = vld [vmem:[#allocation2 + $0x1b0] sm:$0xff] }
 0x221   : > { %v1898_v34 = vmax.f32 %v1834_v27, 0.0  ;;  %v1837_v36 = vadd.f32 %v3362_v51, %v1761_v28  ;;  %v2448_v40 = vpack.c.bf16 %v1896_v29, %v1895_v23  ;;  %v1899_v43 = vmax.f32 %v1835_v30, 0.0  ;;  %v1700_v23 = vld [vmem:[#allocation2 + $0x1a8] sm:$0xff] }
 0x222   : > { %v1900_v42 = vmax.f32 %v1836_v31, 0.0  ;;  %v1838_v38 = vadd.f32 %v3364_v44, %v1762_v24  ;;  %v1764_v3 = vmul.f32 %v3360_v50, %v1688_v32  ;;  %v1839_v53 = vadd.f32 %v3362_v51, %v1763_v37  ;;  %v1702_v31 = vld [vmem:[#allocation2 + $0x1b8] sm:$0xff] }
 0x223   : > { %v2449_v41 = vpack.c.bf16 %v1898_v34, %v1897_v33  ;;  %v1901_v47 = vmax.f32 %v1837_v36, 0.0  ;;  %2135 = vst [vmem:[#allocation8 + $0x80] sm:$0xff] %v2448_v40  ;;  %v1765_v56 = vmul.f32 %v3358_v49, %v1689_v35  ;;  %v1766_v54 = vmul.f32 %v3360_v50, %v1690_v39  ;;  %v1703_v36 = vld [vmem:[#allocation2 + $0x1c0] sm:$0xff] }
 0x224   : > { %v2450_v48 = vpack.c.bf16 %v1900_v42, %v1899_v43  ;;  %v1902_v55 = vmax.f32 %v1838_v38, 0.0  ;;  %v1840_v59 = vadd.f32 %v3364_v44, %v1764_v3  ;;  %v1903_v60 = vmax.f32 %v1839_v53, 0.0 }
 0x225   : > { %2136 = vst [vmem:[#allocation8 + $0x88] sm:$0xff] %v2449_v41  ;;  %v1767_v62 = vmul.f32 %v3358_v49, %v1691_v45  ;;  %v1768_v57 = vmul.f32 %v3360_v50, %v1692_v46  ;;  %v1841_v61 = vadd.f32 %v3362_v51, %v1765_v56  ;;  %v1842_v1 = vadd.f32 %v3364_v44, %v1766_v54  ;;  %v1704_v46 = vld [vmem:[#allocation2 + $0x1c8] sm:$0xff] }
 0x226   : > { %2137 = vst [vmem:[#allocation8 + $0x90] sm:$0xff] %v2450_v48  ;;  %v2451_v2 = vpack.c.bf16 %v1902_v55, %v1901_v47  ;;  %v1769_v5 = vmul.f32 %v3358_v49, %v1693_v52  ;;  %v1904_v6 = vmax.f32 %v1840_v59, 0.0  ;;  %v1770_v8 = vmul.f32 %v3360_v50, %v1694_v58  ;;  %v1705_v52 = vld [vmem:[#allocation2 + $0x1d0] sm:$0xff]  ;;  %v1706_v48 = vld [vmem:[#allocation2 + $0x1d8] sm:$0xff]  ;;  %v1707_v59 = vld [vmem:[#allocation2 + $0x1e0] sm:$0xff] }
 0x227   : > { %v1843_v0 = vadd.f32 %v3362_v51, %v1767_v62  ;;  %v1844_v7 = vadd.f32 %v3364_v44, %v1768_v57  ;;  %v1905_v10 = vmax.f32 %v1841_v61, 0.0  ;;  %v1906_v4 = vmax.f32 %v1842_v1, 0.0  ;;  %v1709_v61 = vld [vmem:[#allocation2 + $0x1f0] sm:$0xff] }
 0x228   : > { %2138 = vst [vmem:[#allocation8 + $0x98] sm:$0xff] %v2451_v2  ;;  %v1845_v12 = vadd.f32 %v3362_v51, %v1769_v5  ;;  %v1771_v13 = vmul.f32 %v3358_v49, %v1695_v63  ;;  %v2452_v16 = vpack.c.bf16 %v1904_v6, %v1903_v60  ;;  %v1846_v14 = vadd.f32 %v3364_v44, %v1770_v8  ;;  %v1708_v60 = vld [vmem:[#allocation2 + $0x1e8] sm:$0xff] }
 0x229   : > { %v1907_v17 = vmax.f32 %v1843_v0, 0.0  ;;  %v1908_v19 = vmax.f32 %v1844_v7, 0.0  ;;  %v2453_v18 = vpack.c.bf16 %v1906_v4, %v1905_v10  ;;  %v1772_v25 = vmul.f32 %v3360_v50, %v1696_v9  ;;  %v1710_v7 = vld [vmem:[#allocation2 + $0x1f8] sm:$0xff] }
 0x22a   : > { %v1909_v22 = vmax.f32 %v1845_v12, 0.0  ;;  %v1847_v26 = vadd.f32 %v3362_v51, %v1771_v13  ;;  %2139 = vst [vmem:[#allocation8 + $0xa0] sm:$0xff] %v2452_v16  ;;  %v1910_v28 = vmax.f32 %v1846_v14, 0.0  ;;  %v1773_v29 = vmul.f32 %v3358_v49, %v1697_v11 }
 0x22b   : > { %v2454_v27 = vpack.c.bf16 %v1908_v19, %v1907_v17  ;;  %v1774_v30 = vmul.f32 %v3360_v50, %v1698_v15  ;;  %2140 = vst [vmem:[#allocation8 + $0xa8] sm:$0xff] %v2453_v18  ;;  %v1848_v24 = vadd.f32 %v3364_v44, %v1772_v25  ;;  %v1775_v33 = vmul.f32 %v3358_v49, %v1699_v20 }
 0x22c   : > { %v1911_v32 = vmax.f32 %v1847_v26, 0.0  ;;  %v1776_v34 = vmul.f32 %v3360_v50, %v1700_v23  ;;  %v2455_v37 = vpack.c.bf16 %v1910_v28, %v1909_v22  ;;  %v1849_v35 = vadd.f32 %v3362_v51, %v1773_v29 }
 0x22d   : > { %2141 = vst [vmem:[#allocation8 + $0xb0] sm:$0xff] %v2454_v27  ;;  %v1850_v39 = vadd.f32 %v3364_v44, %v1774_v30  ;;  %v1777_v40 = vmul.f32 %v3358_v49, %v1701_v21  ;;  %v1912_v43 = vmax.f32 %v1848_v24, 0.0  ;;  %v1851_v42 = vadd.f32 %v3362_v51, %v1775_v33 }
 0x22e   : > { %v1852_v38 = vadd.f32 %v3364_v44, %v1776_v34  ;;  %v1778_v45 = vmul.f32 %v3360_v50, %v1702_v31  ;;  %2142 = vst [vmem:[#allocation8 + $0xb8] sm:$0xff] %v2455_v37  ;;  %v1913_v41 = vmax.f32 %v1849_v35, 0.0  ;;  %v1779_v53 = vmul.f32 %v3358_v49, %v1703_v36 }
 0x22f   : > { %v1914_v47 = vmax.f32 %v1850_v39, 0.0  ;;  %v1853_v3 = vadd.f32 %v3362_v51, %v1777_v40  ;;  %v2456_v55 = vpack.c.bf16 %v1912_v43, %v1911_v32  ;;  %v1915_v56 = vmax.f32 %v1851_v42, 0.0 }
 0x230   : > { %v1916_v54 = vmax.f32 %v1852_v38, 0.0  ;;  %v1854_v58 = vadd.f32 %v3364_v44, %v1778_v45  ;;  %v1780_v63 = vmul.f32 %v3360_v50, %v1704_v46  ;;  %v1855_v2 = vadd.f32 %v3362_v51, %v1779_v53 }
 0x231   : > { %v2457_v62 = vpack.c.bf16 %v1914_v47, %v1913_v41  ;;  %v1917_v57 = vmax.f32 %v1853_v3, 0.0  ;;  %2143 = vst [vmem:[#allocation8 + $0xc0] sm:$0xff] %v2456_v55  ;;  %v1781_v6 = vmul.f32 %v3358_v49, %v1705_v52  ;;  %v1782_v0 = vmul.f32 %v3360_v50, %v1706_v48 }
 0x232   : > { %v2458_v1 = vpack.c.bf16 %v1916_v54, %v1915_v56  ;;  %v1918_v5 = vmax.f32 %v1854_v58, 0.0  ;;  %v1856_v8 = vadd.f32 %v3364_v44, %v1780_v63  ;;  %v1919_v9 = vmax.f32 %v1855_v2, 0.0 }
 0x233   : > { %2144 = vst [vmem:[#allocation8 + $0xc8] sm:$0xff] %v2457_v62  ;;  %v1783_v10 = vmul.f32 %v3358_v49, %v1707_v59  ;;  %v1784_v4 = vmul.f32 %v3360_v50, %v1708_v60  ;;  %v1857_v13 = vadd.f32 %v3362_v51, %v1781_v6  ;;  %v1858_v11 = vadd.f32 %v3364_v44, %v1782_v0 }
 0x234   : > { %2145 = vst [vmem:[#allocation8 + $0xd0] sm:$0xff] %v2458_v1  ;;  %v2459_v12 = vpack.c.bf16 %v1918_v5, %v1917_v57  ;;  %v1785_v15 = vmul.f32 %v3358_v49, %v1709_v61  ;;  %v1920_v16 = vmax.f32 %v1856_v8, 0.0  ;;  %v1786_v14 = vmul.f32 %v3360_v50, %v1710_v7 }
 0x235   : > { %v1859_v17 = vadd.f32 %v3362_v51, %v1783_v10  ;;  %v1860_v19 = vadd.f32 %v3364_v44, %v1784_v4  ;;  %v1921_v20 = vmax.f32 %v1857_v13, 0.0  ;;  %v1922_v23 = vmax.f32 %v1858_v11, 0.0 }
 0x236   : > { %2146 = vst [vmem:[#allocation8 + $0xd8] sm:$0xff] %v2459_v12  ;;  %v1861_v18 = vadd.f32 %v3362_v51, %v1785_v15  ;;  %v2460_v22 = vpack.c.bf16 %v1920_v16, %v1919_v9  ;;  %v1862_v21 = vadd.f32 %v3364_v44, %v1786_v14 }
 0x237   : > { %v1923_v25 = vmax.f32 %v1859_v17, 0.0  ;;  %v1924_v26 = vmax.f32 %v1860_v19, 0.0  ;;  %v2461_v27 = vpack.c.bf16 %v1922_v23, %v1921_v20 }
 0x238   : > { %v1925_v28 = vmax.f32 %v1861_v18, 0.0  ;;  %2147 = vst [vmem:[#allocation8 + $0xe0] sm:$0xff] %v2460_v22  ;;  %v1926_v29 = vmax.f32 %v1862_v21, 0.0 }
 0x239   : > { %v2462_v49 = vpack.c.bf16 %v1924_v26, %v1923_v25  ;;  %2148 = vst [vmem:[#allocation8 + $0xe8] sm:$0xff] %v2461_v27 }
 0x23a   : > { %v2463_v30 = vpack.c.bf16 %v1926_v29, %v1925_v28 }
 0x23b   : > { %2149 = vst [vmem:[#allocation8 + $0xf0] sm:$0xff] %v2462_v49 }
 0x23c   : > { %2150 = vst [vmem:[#allocation8 + $0xf8] sm:$0xff] %v2463_v30 }
 0x23d PF: > { %p3496_p4 = scmp.eq.s32.totalorder %s2286_s21, 2  ;;  %s2835_s30 = smov [#allocation8]  }
 0x23e   : > { %s2163_s6 = sshll.u32 %s2835_s30, 4  ;;  %s2164_s6 = int_to_ptr.vmem [resolvable:$true] %s2163_s6 }
 0x23f   : > { %s2740_s12 = scalar_lea.vmem %s2164_s6, 4096  ;;  %p2747_p0 = scmp.lt.s32.totalorder %s2164_s6, %s2164_s6 }
 0x240   : > { %p2741_p8 = scmp.ne.s32.totalorder %s2164_s6, %s2740_s12  ;;  %p2748_p10 = scmp.lt.s32.totalorder %s2740_s12, %s2740_s12 }
 0x242   : > { %p2742_p2 = pnand %p2741_p8, %p3496_p4  ;;  %p2749_p5 = por %p2748_p10, %p2747_p0 }
 0x244   : > { %p2743_p3 = pneg %p2742_p2 }
 0x246   : > { %p2750_p6 = pnand %p2749_p5, %p2743_p3 }
 0x248   : > { %2753 = shalt.err (!%p2750_p6)
}
 0x249   : > { %s2754_s21 = scalar_lea.hbm %s3544_s4, 4096 }
 0x24a   : > { %p2755_p11 = scmp.ne.s32.totalorder %s3544_s4, %s2754_s21  ;;  %p2760_p7 = scmp.lt.u32.totalorder %s2754_s21, %s3544_s4 }
 0x24c   : > { %p2756_p13 = pnand %p2755_p11, %p3496_p4 }
 0x24e   : > { %p2757_p1 = pneg %p2756_p13 }
 0x250   : > { %p2762_p9 = pnand %p2760_p7, %p2757_p1 }
 0x252   : > { %2765 = shalt.err (!%p2762_p9)
}
 0x253   : > { %s2836_s10 = smov 128   ;;  %s2837_s5 = smov 8  }
 0x254   : > { %2537 = dma.vmem_to_hbm [thread:$0]  (%p3496_p4), %s2164_s6, 4096, %s3544_s4, [#allocation5], %s2836_s10, %s2836_s10, %s2837_s5  }
 0x255   : > { %2799 = dma.done.wait (%p3496_p4), [#allocation5], 4096  }
 0x256   : > { %2801 = vsyncadd (%p3496_p4), [#allocation5], 4294963200 }
 0x257 PF: > { %s21_s20 = sadd.s32 1, %s2824_s20   ;;  %s3552_s15 = smov %s2808_s16 }
 0x258   : > { %p18_p12 = scmp.ge.s32.totalorder %s21_s20, 5   ;;  %s3553_s16 = smov %s2812_s17 }
 0x259   : > { %s3554_s17 = smov %s2910_s26  ;;  %s3555_s18 = smov %s2820_s19 }
 0x25a   : > { %s3556_s19 = smov %s3558_s22  ;;  %20 = sbr.rel (!%p18_p12) target bundleno = 7 (0x7), region = 101 }
 0x261   :  { %2179 = vsyncpa [#allocation4], 1 }
 0x262   :  { %2181 = vsyncpa [#allocation4 + $0x1], 1 }
 0x263   :  { %2182 = vsyncpa [#allocation7], 1 }
 0x264   :  { %2184 = vsyncpa [#allocation7 + $0x1], 1 }
 0x265   :  { %2185 = vsyncpa [#allocation5], 1 }
 0x266   :  { %2187 = vsyncpa [#allocation5 + $0x1], 1 }

</bundles_post_ra>
